<compile_context>
chip_gen: v6e
topology: v6e:2x2x1
jax: 0.10.0
libtpu: 0.0.40
codegen_flags: <defaults>
</compile_context>

<pallas_src>
import jax
import jax.numpy as jnp
import numpy as np
from jax import lax
from jax.experimental import pallas as pl
from jax.experimental.pallas import tpu as pltpu

_EPS = 1e-5


# --------------------------------------------------------------------------- #
# Wrapper-side parameter preparation (done once per call, outside the kernel) #
# --------------------------------------------------------------------------- #
def _lower_conv3x3(w9, win_pad, stride, wo):
  """(9, Ci, Co) taps -> (3, win_pad*Ci, wo*Co) bf16 row-lowered weight mats.

  m[dy, (xcol, ci), (ox, co)] = w[dy, xcol - ox*stride, ci, co]
  for 0 <= xcol - ox*stride <= 2 (zero elsewhere), xcol in padded coords.
  """
  w = np.asarray(w9, np.float32).reshape(3, 3, w9.shape[1], w9.shape[2])
  ci, co = w.shape[2], w.shape[3]
  m = np.zeros((3, win_pad * ci, wo * co), np.float32)
  for dy in range(3):
    for dx in range(3):
      for ox in range(wo):
        xc = ox * stride + dx
        m[dy, xc * ci:(xc + 1) * ci, ox * co:(ox + 1) * co] = w[dy, dx]
  return jnp.asarray(m, jnp.bfloat16)


def _lower_conv1x1(w1, w_in, stride, wo):
  """(1, Ci, Co) -> (w_in*Ci, wo*Co) bf16 lowered 1x1 (strided) conv matrix."""
  w = np.asarray(w1, np.float32).reshape(w1.shape[-2], w1.shape[-1])
  ci, co = w.shape
  m = np.zeros((w_in * ci, wo * co), np.float32)
  for ox in range(wo):
    xc = ox * stride
    m[xc * ci:(xc + 1) * ci, ox * co:(ox + 1) * co] = w
  return jnp.asarray(m, jnp.bfloat16)


def _tile_ch(v, wo):
  """Per-channel vector (C,) -> lane-tiled (1, wo*C) f32 (lane = ox*C + c)."""
  return jnp.asarray(np.tile(np.asarray(v, np.float32), wo)[None, :])


# --------------------------------------------------------------------------- #
# Fused kernel                                                                 #
# --------------------------------------------------------------------------- #
def _make_fused_kernel(N, H, W, Cin, P, Ho, Wo, stride, has_shortcut):
  L1 = (W + 2) * Cin          # padded lane width for conv1 input
  L2 = (Wo + 2) * P           # padded lane width for conv2/conv3 input
  rows = N * Ho
  inv_count = 1.0 / float(N * Ho * Wo)
  f32 = jnp.float32
  bf16 = jnp.bfloat16

  def chan_mean(v):
    # Per-channel mean over rows (cross-sublane reduce) and over the Wo lane
    # groups (circular lane roll-reduce on the XLU; exact f32, result already
    # tiled back to (1, Wo*P) so it broadcasts straight onto v).
    s = jnp.sum(v, axis=0, keepdims=True)                     # (1, Wo*P)
    if Wo & (Wo - 1) == 0:                                    # power-of-two Wo
      sh = P
      while sh < Wo * P:
        s = s + pltpu.roll(s, shift=sh, axis=1)
        sh *= 2
    else:
      t = s
      acc = s
      for _ in range(Wo - 1):
        t = pltpu.roll(t, shift=P, axis=1)
        acc = acc + t
      s = acc
    return s * inv_count

  def bn(v, g_ref, b_ref):
    # Train-mode BatchNorm, two-pass (centered) batch statistics.
    mu = chan_mean(v)
    xc = v - mu
    var = chan_mean(xc * xc)
    scale = g_ref[...] * lax.rsqrt(var + _EPS)
    return xc * scale + b_ref[...]

  def conv(pad_ref, wl_ref, lin, s):
    # Row-lowered 3x3 conv: 3 lane-dense MXU matmuls (one per kernel row dy),
    # bf16 operands, f32 accumulation.  Windows are Ref slices (only the
    # needed rows are loaded).
    acc = jnp.zeros((rows, Wo * P), f32)
    for dy in range(3):
      if s == 1:
        win = pad_ref[:, dy:dy + Ho, :]
      else:
        # TODO(synk): stride>1 strided-Ref path is not exercised at the demo shape.
        win = pad_ref[:, pl.ds(dy, Ho, stride=s), :]
      lhs = win.reshape(rows, lin).astype(bf16)
      acc = acc + jnp.dot(lhs, wl_ref[dy], preferred_element_type=f32)
    return acc

  def kernel(*refs):
    if has_shortcut:
      (x_ref, w1l, g1t, b1t, w2l, g2t, b2t, w3l, g3t, b3t,
       wsl, gst, bst, out_ref, pad1, pad2) = refs
    else:
      (x_ref, w1l, g1t, b1t, w2l, g2t, b2t, w3l, g3t, b3t,
       out_ref, pad1, pad2) = refs

    # ---- zero only the halos of the padded scratch (interiors overwritten) --
    pad1[:, 0:1, :] = jnp.zeros((N, 1, L1), f32)
    pad1[:, H + 1:H + 2, :] = jnp.zeros((N, 1, L1), f32)
    pad1[:, 1:H + 1, 0:Cin] = jnp.zeros((N, H, Cin), f32)
    pad1[:, 1:H + 1, (W + 1) * Cin:L1] = jnp.zeros((N, H, Cin), f32)
    pad2[:, 0:1, :] = jnp.zeros((N, 1, L2), f32)
    pad2[:, Ho + 1:Ho + 2, :] = jnp.zeros((N, 1, L2), f32)
    pad2[:, 1:Ho + 1, 0:P] = jnp.zeros((N, Ho, P), f32)
    pad2[:, 1:Ho + 1, (Wo + 1) * P:L2] = jnp.zeros((N, Ho, P), f32)

    # ---- stage 1: conv1 (3x3, stride) + bn1 + relu ---------------------------
    pad1[:, 1:H + 1, Cin:(W + 1) * Cin] = x_ref[...]
    h = jnp.maximum(bn(conv(pad1, w1l, L1, stride), g1t, b1t), 0.0)

    # ---- stage 2: conv2 (3x3, stride 1) + bn2 + relu -------------------------
    pad2[:, 1:Ho + 1, P:(Wo + 1) * P] = h.reshape(N, Ho, Wo * P)
    h = jnp.maximum(bn(conv(pad2, w2l, L2, 1), g2t, b2t), 0.0)

    # ---- stage 3: conv3 (3x3, stride 1) + bn3 (relu after residual) ----------
    pad2[:, 1:Ho + 1, P:(Wo + 1) * P] = h.reshape(N, Ho, Wo * P)
    h = bn(conv(pad2, w3l, L2, 1), g3t, b3t)

    # ---- shortcut: 1x1 conv (stride) + bn, or identity (x_ref re-read late) --
    if has_shortcut:
      if stride == 1:
        xs = x_ref[...]
      else:
        xs = x_ref[:, pl.ds(0, Ho, stride=stride), :]
      sc = jnp.dot(xs.reshape(rows, W * Cin).astype(bf16), wsl[...],
                   preferred_element_type=f32)
      sc = bn(sc, gst, bst)
    else:
      sc = x_ref[...].reshape(rows, Wo * P)      # Cin == P, stride == 1

    # Lane-dense final store: (N*Ho, Wo*P) == (32, 128) at the demo shape
    # (exactly one unmasked lane tile wide; other shapes degrade to masked
    # vst but stay correct).
    out_ref[...] = jnp.maximum(h + sc, 0.0).astype(out_ref.dtype)

  return kernel


def reuse_block3_forward(x_nchw, params, stride=1):
  """Fused Pallas implementation of ReuseBlock3.forward.  Input/output NCHW."""
  N, Cin, H, W = x_nchw.shape
  P = params["w1"].shape[-1]
  Ho = (H - 1) // stride + 1
  Wo = (W - 1) // stride + 1
  has_shortcut = (stride != 1) or (Cin != P)

  # NCHW -> NHWC -> lane-dense (N, H, W*Cin) slab (reshape is free, row-major).
  x = jnp.transpose(x_nchw, (0, 2, 3, 1)).reshape(N, H, W * Cin)

  w1l = _lower_conv3x3(params["w1"], W + 2, stride, Wo)
  w2l = _lower_conv3x3(params["w2"], Wo + 2, 1, Wo)
  w3l = _lower_conv3x3(params["w3"], Wo + 2, 1, Wo)

  inputs = [
      x,
      w1l, _tile_ch(params["g1"], Wo), _tile_ch(params["b1"], Wo),
      w2l, _tile_ch(params["g2"], Wo), _tile_ch(params["b2"], Wo),
      w3l, _tile_ch(params["g3"], Wo), _tile_ch(params["b3"], Wo),
  ]
  if has_shortcut:
    inputs += [_lower_conv1x1(params["ws"], W, stride, Wo),
               _tile_ch(params["gs"], Wo), _tile_ch(params["bs"], Wo)]

  kernel = _make_fused_kernel(N, H, W, Cin, P, Ho, Wo, stride, has_shortcut)
  vmem = pl.BlockSpec(memory_space=pltpu.MemorySpace.VMEM)

  out2d = pl.pallas_call(
      kernel,
      out_shape=jax.ShapeDtypeStruct((N * Ho, Wo * P), x.dtype),
      in_specs=[vmem] * len(inputs),
      out_specs=vmem,
      scratch_shapes=[
          pltpu.VMEM((N, H + 2, (W + 2) * Cin), jnp.float32),   # padded conv1 input
          pltpu.VMEM((N, Ho + 2, (Wo + 2) * P), jnp.float32),   # padded conv2/3 input
      ],
  )(*inputs)

  out = out2d.reshape(N, Ho, Wo, P)                             # free reshape
  return jnp.transpose(out, (0, 3, 1, 2))                       # NHWC -> NCHW


# ----------------------- pure-JAX reference (for verification) ---------------
def _ref_forward(x_nchw, params, stride=1):
  # Conv operands are cast to bf16 (with f32 accumulation) to mirror the
  # kernel's MXU-native path; BN / ReLU / residual math stays in f32.
  # (Against a pure-f32 reference the fused kernel agrees to ~1e-2.)
  x = jnp.transpose(x_nchw, (0, 2, 3, 1))

  def conv(h, w, k, s, p):
    w_hwio = w.reshape(k, k, w.shape[1], w.shape[2]).astype(jnp.bfloat16)
    return lax.conv_general_dilated(
        h.astype(jnp.bfloat16), w_hwio, window_strides=(s, s),
        padding=[(p, p), (p, p)],
        dimension_numbers=("NHWC", "HWIO", "NHWC"),
        preferred_element_type=jnp.float32)

  def bn(y, g, b):
    mu = jnp.mean(y, axis=(0, 1, 2), keepdims=True)
    var = jnp.mean((y - mu) ** 2, axis=(0, 1, 2), keepdims=True)
    return (y - mu) * lax.rsqrt(var + _EPS) * g + b

  out = jax.nn.relu(bn(conv(x, params["w1"], 3, stride, 1), params["g1"], params["b1"]))
  out = jax.nn.relu(bn(conv(out, params["w2"], 3, 1, 1), params["g2"], params["b2"]))
  out = bn(conv(out, params["w3"], 3, 1, 1), params["g3"], params["b3"])
  Cin, Cout = x.shape[-1], params["w1"].shape[-1]
  if stride != 1 or Cin != Cout:
    sc = bn(conv(x, params["ws"], 1, stride, 0), params["gs"], params["bs"])
  else:
    sc = x
  out = jax.nn.relu(out + sc)
  return jnp.transpose(out, (0, 3, 1, 2))


if __name__ == "__main__":
  key = jax.random.PRNGKey(0)
  N, Cin, H, W = 2, 4, 16, 16
  planes = 8
  stride = 1          # shortcut conv path triggered by Cin != planes

  ks = jax.random.split(key, 13)
  f32 = jnp.float32
  params = {
      "w1": 0.1 * jax.random.normal(ks[0], (9, Cin, planes), f32),
      "g1": 1.0 + 0.1 * jax.random.normal(ks[1], (planes,), f32),
      "b1": 0.1 * jax.random.normal(ks[2], (planes,), f32),
      "w2": 0.1 * jax.random.normal(ks[3], (9, planes, planes), f32),
      "g2": 1.0 + 0.1 * jax.random.normal(ks[4], (planes,), f32),
      "b2": 0.1 * jax.random.normal(ks[5], (planes,), f32),
      "w3": 0.1 * jax.random.normal(ks[6], (9, planes, planes), f32),
      "g3": 1.0 + 0.1 * jax.random.normal(ks[7], (planes,), f32),
      "b3": 0.1 * jax.random.normal(ks[8], (planes,), f32),
      "ws": 0.1 * jax.random.normal(ks[9], (1, Cin, planes), f32),
      "gs": 1.0 + 0.1 * jax.random.normal(ks[10], (planes,), f32),
      "bs": 0.1 * jax.random.normal(ks[11], (planes,), f32),
  }
  x = jax.random.normal(ks[12], (N, Cin, H, W), f32)

  out = jax.block_until_ready(reuse_block3_forward(x, params, stride=stride))
  assert out.shape == (N, planes, H, W), out.shape

  ref = jax.block_until_ready(_ref_forward(x, params, stride=stride))
  np.testing.assert_allclose(np.asarray(out), np.asarray(ref), rtol=5e-3, atol=5e-3)

  print("KERNEL_OK")
</pallas_src>

<mosaic_0001>
module attributes {stable_mosaic.version = 11 : i64} {
  func.func @kernel(%arg0: memref<2x16x64xf32, #tpu.memory_space<vmem>>, %arg1: memref<3x72x128xbf16, #tpu.memory_space<vmem>>, %arg2: memref<1x128xf32, #tpu.memory_space<vmem>>, %arg3: memref<1x128xf32, #tpu.memory_space<vmem>>, %arg4: memref<3x144x128xbf16, #tpu.memory_space<vmem>>, %arg5: memref<1x128xf32, #tpu.memory_space<vmem>>, %arg6: memref<1x128xf32, #tpu.memory_space<vmem>>, %arg7: memref<3x144x128xbf16, #tpu.memory_space<vmem>>, %arg8: memref<1x128xf32, #tpu.memory_space<vmem>>, %arg9: memref<1x128xf32, #tpu.memory_space<vmem>>, %arg10: memref<64x128xbf16, #tpu.memory_space<vmem>>, %arg11: memref<1x128xf32, #tpu.memory_space<vmem>>, %arg12: memref<1x128xf32, #tpu.memory_space<vmem>>, %arg13: memref<32x128xf32, #tpu.memory_space<vmem>>, %arg14: memref<2x18x72xf32, #tpu.memory_space<vmem>>, %arg15: memref<2x18x144xf32, #tpu.memory_space<vmem>>) attributes {dimension_semantics = [], scalar_prefetch = 0 : i64, scratch_operands = 2 : i64, tpu.core_type = #tpu.core_type<tc>} {
    %cst = arith.constant 0.000000e+00 : f32
    %0 = vector.broadcast %cst : f32 to vector<2x1x72xf32>
    %c0 = arith.constant 0 : index
    %c0_0 = arith.constant 0 : index
    %c0_1 = arith.constant 0 : index
    %1 = vector.load %arg14[%c0, %c0_0, %c0_1] : memref<2x18x72xf32, #tpu.memory_space<vmem>>, vector<2x1x72xf32>
    tpu.vector_store %arg14[%c0, %c0_0, %c0_1], %0 {strides = array<i32>} : memref<2x18x72xf32, #tpu.memory_space<vmem>>, vector<2x1x72xf32>,
    %cst_2 = arith.constant 0.000000e+00 : f32
    %2 = vector.broadcast %cst_2 : f32 to vector<2x1x72xf32>
    %c0_3 = arith.constant 0 : index
    %c17 = arith.constant 17 : index
    %c0_4 = arith.constant 0 : index
    %3 = vector.load %arg14[%c0_3, %c17, %c0_4] : memref<2x18x72xf32, #tpu.memory_space<vmem>>, vector<2x1x72xf32>
    tpu.vector_store %arg14[%c0_3, %c17, %c0_4], %2 {strides = array<i32>} : memref<2x18x72xf32, #tpu.memory_space<vmem>>, vector<2x1x72xf32>,
    %cst_5 = arith.constant 0.000000e+00 : f32
    %4 = vector.broadcast %cst_5 : f32 to vector<2x16x4xf32>
    %c0_6 = arith.constant 0 : index
    %c1 = arith.constant 1 : index
    %c0_7 = arith.constant 0 : index
    %5 = vector.load %arg14[%c0_6, %c1, %c0_7] : memref<2x18x72xf32, #tpu.memory_space<vmem>>, vector<2x16x4xf32>
    tpu.vector_store %arg14[%c0_6, %c1, %c0_7], %4 {strides = array<i32>} : memref<2x18x72xf32, #tpu.memory_space<vmem>>, vector<2x16x4xf32>,
    %cst_8 = arith.constant 0.000000e+00 : f32
    %6 = vector.broadcast %cst_8 : f32 to vector<2x16x4xf32>
    %c0_9 = arith.constant 0 : index
    %c1_10 = arith.constant 1 : index
    %c68 = arith.constant 68 : index
    %7 = vector.load %arg14[%c0_9, %c1_10, %c68] : memref<2x18x72xf32, #tpu.memory_space<vmem>>, vector<2x16x4xf32>
    tpu.vector_store %arg14[%c0_9, %c1_10, %c68], %6 {strides = array<i32>} : memref<2x18x72xf32, #tpu.memory_space<vmem>>, vector<2x16x4xf32>,
    %cst_11 = arith.constant 0.000000e+00 : f32
    %8 = vector.broadcast %cst_11 : f32 to vector<2x1x144xf32>
    %c0_12 = arith.constant 0 : index
    %c0_13 = arith.constant 0 : index
    %c0_14 = arith.constant 0 : index
    %9 = vector.load %arg15[%c0_12, %c0_13, %c0_14] : memref<2x18x144xf32, #tpu.memory_space<vmem>>, vector<2x1x144xf32>
    tpu.vector_store %arg15[%c0_12, %c0_13, %c0_14], %8 {strides = array<i32>} : memref<2x18x144xf32, #tpu.memory_space<vmem>>, vector<2x1x144xf32>,
    %cst_15 = arith.constant 0.000000e+00 : f32
    %10 = vector.broadcast %cst_15 : f32 to vector<2x1x144xf32>
    %c0_16 = arith.constant 0 : index
    %c17_17 = arith.constant 17 : index
    %c0_18 = arith.constant 0 : index
    %11 = vector.load %arg15[%c0_16, %c17_17, %c0_18] : memref<2x18x144xf32, #tpu.memory_space<vmem>>, vector<2x1x144xf32>
    tpu.vector_store %arg15[%c0_16, %c17_17, %c0_18], %10 {strides = array<i32>} : memref<2x18x144xf32, #tpu.memory_space<vmem>>, vector<2x1x144xf32>,
    %cst_19 = arith.constant 0.000000e+00 : f32
    %12 = vector.broadcast %cst_19 : f32 to vector<2x16x8xf32>
    %c0_20 = arith.constant 0 : index
    %c1_21 = arith.constant 1 : index
    %c0_22 = arith.constant 0 : index
    %13 = vector.load %arg15[%c0_20, %c1_21, %c0_22] : memref<2x18x144xf32, #tpu.memory_space<vmem>>, vector<2x16x8xf32>
    tpu.vector_store %arg15[%c0_20, %c1_21, %c0_22], %12 {strides = array<i32>} : memref<2x18x144xf32, #tpu.memory_space<vmem>>, vector<2x16x8xf32>,
    %cst_23 = arith.constant 0.000000e+00 : f32
    %14 = vector.broadcast %cst_23 : f32 to vector<2x16x8xf32>
    %c0_24 = arith.constant 0 : index
    %c1_25 = arith.constant 1 : index
    %c136 = arith.constant 136 : index
    %15 = vector.load %arg15[%c0_24, %c1_25, %c136] : memref<2x18x144xf32, #tpu.memory_space<vmem>>, vector<2x16x8xf32>
    tpu.vector_store %arg15[%c0_24, %c1_25, %c136], %14 {strides = array<i32>} : memref<2x18x144xf32, #tpu.memory_space<vmem>>, vector<2x16x8xf32>,
    %c0_26 = arith.constant 0 : index
    %c0_27 = arith.constant 0 : index
    %c0_28 = arith.constant 0 : index
    %16 = vector.load %arg0[%c0_26, %c0_27, %c0_28] : memref<2x16x64xf32, #tpu.memory_space<vmem>>, vector<2x16x64xf32>
    %c0_29 = arith.constant 0 : index
    %c1_30 = arith.constant 1 : index
    %c4 = arith.constant 4 : index
    %17 = vector.load %arg14[%c0_29, %c1_30, %c4] : memref<2x18x72xf32, #tpu.memory_space<vmem>>, vector<2x16x64xf32>
    tpu.vector_store %arg14[%c0_29, %c1_30, %c4], %16 {strides = array<i32>} : memref<2x18x72xf32, #tpu.memory_space<vmem>>, vector<2x16x64xf32>,
    %cst_31 = arith.constant 0.000000e+00 : f32
    %18 = vector.broadcast %cst_31 : f32 to vector<32x128xf32>
    %c0_32 = arith.constant 0 : index
    %c0_33 = arith.constant 0 : index
    %c0_34 = arith.constant 0 : index
    %19 = vector.load %arg14[%c0_32, %c0_33, %c0_34] : memref<2x18x72xf32, #tpu.memory_space<vmem>>, vector<2x16x72xf32>
    %20 = vector.shape_cast %19 : vector<2x16x72xf32> to vector<32x72xf32>
    %21 = arith.truncf %20 : vector<32x72xf32> to vector<32x72xbf16>
    %c0_35 = arith.constant 0 : index
    %c0_36 = arith.constant 0 : index
    %c0_37 = arith.constant 0 : index
    %22 = vector.load %arg1[%c0_35, %c0_36, %c0_37] : memref<3x72x128xbf16, #tpu.memory_space<vmem>>, vector<1x72x128xbf16>
    %23 = vector.shape_cast %22 : vector<1x72x128xbf16> to vector<72x128xbf16>
    %cst_38 = arith.constant dense<0.000000e+00> : vector<32x128xf32>
    %24 = tpu.matmul %21, %23, %cst_38 {dimension_numbers = #tpu.dot_dimension_numbers<[1], [0], [0], [1], [0, 0, 1, 1], [], []>} : vector<32x72xbf16>, vector<72x128xbf16>, vector<32x128xf32> -> vector<32x128xf32>
    %25 = arith.addf %18, %24 : vector<32x128xf32>
    %c0_39 = arith.constant 0 : index
    %c1_40 = arith.constant 1 : index
    %c0_41 = arith.constant 0 : index
    %26 = vector.load %arg14[%c0_39, %c1_40, %c0_41] : memref<2x18x72xf32, #tpu.memory_space<vmem>>, vector<2x16x72xf32>
    %27 = vector.shape_cast %26 : vector<2x16x72xf32> to vector<32x72xf32>
    %28 = arith.truncf %27 : vector<32x72xf32> to vector<32x72xbf16>
    %c1_42 = arith.constant 1 : index
    %c0_43 = arith.constant 0 : index
    %c0_44 = arith.constant 0 : index
    %29 = vector.load %arg1[%c1_42, %c0_43, %c0_44] : memref<3x72x128xbf16, #tpu.memory_space<vmem>>, vector<1x72x128xbf16>
    %30 = vector.shape_cast %29 : vector<1x72x128xbf16> to vector<72x128xbf16>
    %cst_45 = arith.constant dense<0.000000e+00> : vector<32x128xf32>
    %31 = tpu.matmul %28, %30, %cst_45 {dimension_numbers = #tpu.dot_dimension_numbers<[1], [0], [0], [1], [0, 0, 1, 1], [], []>} : vector<32x72xbf16>, vector<72x128xbf16>, vector<32x128xf32> -> vector<32x128xf32>
    %32 = arith.addf %25, %31 : vector<32x128xf32>
    %c0_46 = arith.constant 0 : index
    %c2 = arith.constant 2 : index
    %c0_47 = arith.constant 0 : index
    %33 = vector.load %arg14[%c0_46, %c2, %c0_47] : memref<2x18x72xf32, #tpu.memory_space<vmem>>, vector<2x16x72xf32>
    %34 = vector.shape_cast %33 : vector<2x16x72xf32> to vector<32x72xf32>
    %35 = arith.truncf %34 : vector<32x72xf32> to vector<32x72xbf16>
    %c2_48 = arith.constant 2 : index
    %c0_49 = arith.constant 0 : index
    %c0_50 = arith.constant 0 : index
    %36 = vector.load %arg1[%c2_48, %c0_49, %c0_50] : memref<3x72x128xbf16, #tpu.memory_space<vmem>>, vector<1x72x128xbf16>
    %37 = vector.shape_cast %36 : vector<1x72x128xbf16> to vector<72x128xbf16>
    %cst_51 = arith.constant dense<0.000000e+00> : vector<32x128xf32>
    %38 = tpu.matmul %35, %37, %cst_51 {dimension_numbers = #tpu.dot_dimension_numbers<[1], [0], [0], [1], [0, 0, 1, 1], [], []>} : vector<32x72xbf16>, vector<72x128xbf16>, vector<32x128xf32> -> vector<32x128xf32>
    %39 = arith.addf %32, %38 : vector<32x128xf32>
    %cst_52 = arith.constant dense<0.000000e+00> : vector<128xf32>
    %40 = vector.multi_reduction <add>, %39, %cst_52 [0] : vector<32x128xf32> to vector<128xf32>
    %41 = vector.shape_cast %40 : vector<128xf32> to vector<1x128xf32>
    %c8_i32 = arith.constant 8 : i32
    %42 = tpu.dynamic_rotate %41 by %c8_i32 dim 1 : vector<1x128xf32>, i32 -> vector<1x128xf32>
    %43 = arith.addf %41, %42 : vector<1x128xf32>
    %c16_i32 = arith.constant 16 : i32
    %44 = tpu.dynamic_rotate %43 by %c16_i32 dim 1 : vector<1x128xf32>, i32 -> vector<1x128xf32>
    %45 = arith.addf %43, %44 : vector<1x128xf32>
    %c32_i32 = arith.constant 32 : i32
    %46 = tpu.dynamic_rotate %45 by %c32_i32 dim 1 : vector<1x128xf32>, i32 -> vector<1x128xf32>
    %47 = arith.addf %45, %46 : vector<1x128xf32>
    %c64_i32 = arith.constant 64 : i32
    %48 = tpu.dynamic_rotate %47 by %c64_i32 dim 1 : vector<1x128xf32>, i32 -> vector<1x128xf32>
    %49 = arith.addf %47, %48 : vector<1x128xf32>
    %cst_53 = arith.constant 0.001953125 : f32
    %50 = vector.broadcast %cst_53 : f32 to vector<1x128xf32>
    %51 = arith.mulf %49, %50 : vector<1x128xf32>
    %52 = vector.broadcast %51 : vector<1x128xf32> to vector<32x128xf32>
    %53 = arith.subf %39, %52 : vector<32x128xf32>
    %54 = arith.mulf %53, %53 : vector<32x128xf32>
    %cst_54 = arith.constant dense<0.000000e+00> : vector<128xf32>
    %55 = vector.multi_reduction <add>, %54, %cst_54 [0] : vector<32x128xf32> to vector<128xf32>
    %56 = vector.shape_cast %55 : vector<128xf32> to vector<1x128xf32>
    %c8_i32_55 = arith.constant 8 : i32
    %57 = tpu.dynamic_rotate %56 by %c8_i32_55 dim 1 : vector<1x128xf32>, i32 -> vector<1x128xf32>
    %58 = arith.addf %56, %57 : vector<1x128xf32>
    %c16_i32_56 = arith.constant 16 : i32
    %59 = tpu.dynamic_rotate %58 by %c16_i32_56 dim 1 : vector<1x128xf32>, i32 -> vector<1x128xf32>
    %60 = arith.addf %58, %59 : vector<1x128xf32>
    %c32_i32_57 = arith.constant 32 : i32
    %61 = tpu.dynamic_rotate %60 by %c32_i32_57 dim 1 : vector<1x128xf32>, i32 -> vector<1x128xf32>
    %62 = arith.addf %60, %61 : vector<1x128xf32>
    %c64_i32_58 = arith.constant 64 : i32
    %63 = tpu.dynamic_rotate %62 by %c64_i32_58 dim 1 : vector<1x128xf32>, i32 -> vector<1x128xf32>
    %64 = arith.addf %62, %63 : vector<1x128xf32>
    %cst_59 = arith.constant 0.001953125 : f32
    %65 = vector.broadcast %cst_59 : f32 to vector<1x128xf32>
    %66 = arith.mulf %64, %65 : vector<1x128xf32>
    %c0_60 = arith.constant 0 : index
    %c0_61 = arith.constant 0 : index
    %67 = vector.load %arg2[%c0_60, %c0_61] : memref<1x128xf32, #tpu.memory_space<vmem>>, vector<1x128xf32>
    %cst_62 = arith.constant 9.99999974E-6 : f32
    %68 = vector.broadcast %cst_62 : f32 to vector<1x128xf32>
    %69 = arith.addf %66, %68 : vector<1x128xf32>
    %70 = math.rsqrt %69 : vector<1x128xf32>
    %71 = arith.mulf %67, %70 : vector<1x128xf32>
    %72 = vector.broadcast %71 : vector<1x128xf32> to vector<32x128xf32>
    %73 = arith.mulf %53, %72 : vector<32x128xf32>
    %c0_63 = arith.constant 0 : index
    %c0_64 = arith.constant 0 : index
    %74 = vector.load %arg3[%c0_63, %c0_64] : memref<1x128xf32, #tpu.memory_space<vmem>>, vector<1x128xf32>
    %75 = vector.broadcast %74 : vector<1x128xf32> to vector<32x128xf32>
    %76 = arith.addf %73, %75 : vector<32x128xf32>
    %cst_65 = arith.constant 0.000000e+00 : f32
    %77 = vector.broadcast %cst_65 : f32 to vector<32x128xf32>
    %78 = arith.maximumf %76, %77 : vector<32x128xf32>
    %79 = vector.shape_cast %78 : vector<32x128xf32> to vector<2x16x128xf32>
    %c0_66 = arith.constant 0 : index
    %c1_67 = arith.constant 1 : index
    %c8 = arith.constant 8 : index
    %80 = vector.load %arg15[%c0_66, %c1_67, %c8] : memref<2x18x144xf32, #tpu.memory_space<vmem>>, vector<2x16x128xf32>
    tpu.vector_store %arg15[%c0_66, %c1_67, %c8], %79 {strides = array<i32>} : memref<2x18x144xf32, #tpu.memory_space<vmem>>, vector<2x16x128xf32>,
    %cst_68 = arith.constant 0.000000e+00 : f32
    %81 = vector.broadcast %cst_68 : f32 to vector<32x128xf32>
    %c0_69 = arith.constant 0 : index
    %c0_70 = arith.constant 0 : index
    %c0_71 = arith.constant 0 : index
    %82 = vector.load %arg15[%c0_69, %c0_70, %c0_71] : memref<2x18x144xf32, #tpu.memory_space<vmem>>, vector<2x16x144xf32>
    %83 = vector.shape_cast %82 : vector<2x16x144xf32> to vector<32x144xf32>
    %84 = arith.truncf %83 : vector<32x144xf32> to vector<32x144xbf16>
    %c0_72 = arith.constant 0 : index
    %c0_73 = arith.constant 0 : index
    %c0_74 = arith.constant 0 : index
    %85 = vector.load %arg4[%c0_72, %c0_73, %c0_74] : memref<3x144x128xbf16, #tpu.memory_space<vmem>>, vector<1x144x128xbf16>
    %86 = vector.shape_cast %85 : vector<1x144x128xbf16> to vector<144x128xbf16>
    %cst_75 = arith.constant dense<0.000000e+00> : vector<32x128xf32>
    %87 = tpu.matmul %84, %86, %cst_75 {dimension_numbers = #tpu.dot_dimension_numbers<[1], [0], [0], [1], [0, 0, 1, 1], [], []>} : vector<32x144xbf16>, vector<144x128xbf16>, vector<32x128xf32> -> vector<32x128xf32>
    %88 = arith.addf %81, %87 : vector<32x128xf32>
    %c0_76 = arith.constant 0 : index
    %c1_77 = arith.constant 1 : index
    %c0_78 = arith.constant 0 : index
    %89 = vector.load %arg15[%c0_76, %c1_77, %c0_78] : memref<2x18x144xf32, #tpu.memory_space<vmem>>, vector<2x16x144xf32>
    %90 = vector.shape_cast %89 : vector<2x16x144xf32> to vector<32x144xf32>
    %91 = arith.truncf %90 : vector<32x144xf32> to vector<32x144xbf16>
    %c1_79 = arith.constant 1 : index
    %c0_80 = arith.constant 0 : index
    %c0_81 = arith.constant 0 : index
    %92 = vector.load %arg4[%c1_79, %c0_80, %c0_81] : memref<3x144x128xbf16, #tpu.memory_space<vmem>>, vector<1x144x128xbf16>
    %93 = vector.shape_cast %92 : vector<1x144x128xbf16> to vector<144x128xbf16>
    %cst_82 = arith.constant dense<0.000000e+00> : vector<32x128xf32>
    %94 = tpu.matmul %91, %93, %cst_82 {dimension_numbers = #tpu.dot_dimension_numbers<[1], [0], [0], [1], [0, 0, 1, 1], [], []>} : vector<32x144xbf16>, vector<144x128xbf16>, vector<32x128xf32> -> vector<32x128xf32>
    %95 = arith.addf %88, %94 : vector<32x128xf32>
    %c0_83 = arith.constant 0 : index
    %c2_84 = arith.constant 2 : index
    %c0_85 = arith.constant 0 : index
    %96 = vector.load %arg15[%c0_83, %c2_84, %c0_85] : memref<2x18x144xf32, #tpu.memory_space<vmem>>, vector<2x16x144xf32>
    %97 = vector.shape_cast %96 : vector<2x16x144xf32> to vector<32x144xf32>
    %98 = arith.truncf %97 : vector<32x144xf32> to vector<32x144xbf16>
    %c2_86 = arith.constant 2 : index
    %c0_87 = arith.constant 0 : index
    %c0_88 = arith.constant 0 : index
    %99 = vector.load %arg4[%c2_86, %c0_87, %c0_88] : memref<3x144x128xbf16, #tpu.memory_space<vmem>>, vector<1x144x128xbf16>
    %100 = vector.shape_cast %99 : vector<1x144x128xbf16> to vector<144x128xbf16>
    %cst_89 = arith.constant dense<0.000000e+00> : vector<32x128xf32>
    %101 = tpu.matmul %98, %100, %cst_89 {dimension_numbers = #tpu.dot_dimension_numbers<[1], [0], [0], [1], [0, 0, 1, 1], [], []>} : vector<32x144xbf16>, vector<144x128xbf16>, vector<32x128xf32> -> vector<32x128xf32>
    %102 = arith.addf %95, %101 : vector<32x128xf32>
    %cst_90 = arith.constant dense<0.000000e+00> : vector<128xf32>
    %103 = vector.multi_reduction <add>, %102, %cst_90 [0] : vector<32x128xf32> to vector<128xf32>
    %104 = vector.shape_cast %103 : vector<128xf32> to vector<1x128xf32>
    %c8_i32_91 = arith.constant 8 : i32
    %105 = tpu.dynamic_rotate %104 by %c8_i32_91 dim 1 : vector<1x128xf32>, i32 -> vector<1x128xf32>
    %106 = arith.addf %104, %105 : vector<1x128xf32>
    %c16_i32_92 = arith.constant 16 : i32
    %107 = tpu.dynamic_rotate %106 by %c16_i32_92 dim 1 : vector<1x128xf32>, i32 -> vector<1x128xf32>
    %108 = arith.addf %106, %107 : vector<1x128xf32>
    %c32_i32_93 = arith.constant 32 : i32
    %109 = tpu.dynamic_rotate %108 by %c32_i32_93 dim 1 : vector<1x128xf32>, i32 -> vector<1x128xf32>
    %110 = arith.addf %108, %109 : vector<1x128xf32>
    %c64_i32_94 = arith.constant 64 : i32
    %111 = tpu.dynamic_rotate %110 by %c64_i32_94 dim 1 : vector<1x128xf32>, i32 -> vector<1x128xf32>
    %112 = arith.addf %110, %111 : vector<1x128xf32>
    %cst_95 = arith.constant 0.001953125 : f32
    %113 = vector.broadcast %cst_95 : f32 to vector<1x128xf32>
    %114 = arith.mulf %112, %113 : vector<1x128xf32>
    %115 = vector.broadcast %114 : vector<1x128xf32> to vector<32x128xf32>
    %116 = arith.subf %102, %115 : vector<32x128xf32>
    %117 = arith.mulf %116, %116 : vector<32x128xf32>
    %cst_96 = arith.constant dense<0.000000e+00> : vector<128xf32>
    %118 = vector.multi_reduction <add>, %117, %cst_96 [0] : vector<32x128xf32> to vector<128xf32>
    %119 = vector.shape_cast %118 : vector<128xf32> to vector<1x128xf32>
    %c8_i32_97 = arith.constant 8 : i32
    %120 = tpu.dynamic_rotate %119 by %c8_i32_97 dim 1 : vector<1x128xf32>, i32 -> vector<1x128xf32>
    %121 = arith.addf %119, %120 : vector<1x128xf32>
    %c16_i32_98 = arith.constant 16 : i32
    %122 = tpu.dynamic_rotate %121 by %c16_i32_98 dim 1 : vector<1x128xf32>, i32 -> vector<1x128xf32>
    %123 = arith.addf %121, %122 : vector<1x128xf32>
    %c32_i32_99 = arith.constant 32 : i32
    %124 = tpu.dynamic_rotate %123 by %c32_i32_99 dim 1 : vector<1x128xf32>, i32 -> vector<1x128xf32>
    %125 = arith.addf %123, %124 : vector<1x128xf32>
    %c64_i32_100 = arith.constant 64 : i32
    %126 = tpu.dynamic_rotate %125 by %c64_i32_100 dim 1 : vector<1x128xf32>, i32 -> vector<1x128xf32>
    %127 = arith.addf %125, %126 : vector<1x128xf32>
    %cst_101 = arith.constant 0.001953125 : f32
    %128 = vector.broadcast %cst_101 : f32 to vector<1x128xf32>
    %129 = arith.mulf %127, %128 : vector<1x128xf32>
    %c0_102 = arith.constant 0 : index
    %c0_103 = arith.constant 0 : index
    %130 = vector.load %arg5[%c0_102, %c0_103] : memref<1x128xf32, #tpu.memory_space<vmem>>, vector<1x128xf32>
    %cst_104 = arith.constant 9.99999974E-6 : f32
    %131 = vector.broadcast %cst_104 : f32 to vector<1x128xf32>
    %132 = arith.addf %129, %131 : vector<1x128xf32>
    %133 = math.rsqrt %132 : vector<1x128xf32>
    %134 = arith.mulf %130, %133 : vector<1x128xf32>
    %135 = vector.broadcast %134 : vector<1x128xf32> to vector<32x128xf32>
    %136 = arith.mulf %116, %135 : vector<32x128xf32>
    %c0_105 = arith.constant 0 : index
    %c0_106 = arith.constant 0 : index
    %137 = vector.load %arg6[%c0_105, %c0_106] : memref<1x128xf32, #tpu.memory_space<vmem>>, vector<1x128xf32>
    %138 = vector.broadcast %137 : vector<1x128xf32> to vector<32x128xf32>
    %139 = arith.addf %136, %138 : vector<32x128xf32>
    %cst_107 = arith.constant 0.000000e+00 : f32
    %140 = vector.broadcast %cst_107 : f32 to vector<32x128xf32>
    %141 = arith.maximumf %139, %140 : vector<32x128xf32>
    %142 = vector.shape_cast %141 : vector<32x128xf32> to vector<2x16x128xf32>
    %c0_108 = arith.constant 0 : index
    %c1_109 = arith.constant 1 : index
    %c8_110 = arith.constant 8 : index
    %143 = vector.load %arg15[%c0_108, %c1_109, %c8_110] : memref<2x18x144xf32, #tpu.memory_space<vmem>>, vector<2x16x128xf32>
    tpu.vector_store %arg15[%c0_108, %c1_109, %c8_110], %142 {strides = array<i32>} : memref<2x18x144xf32, #tpu.memory_space<vmem>>, vector<2x16x128xf32>,
    %cst_111 = arith.constant 0.000000e+00 : f32
    %144 = vector.broadcast %cst_111 : f32 to vector<32x128xf32>
    %c0_112 = arith.constant 0 : index
    %c0_113 = arith.constant 0 : index
    %c0_114 = arith.constant 0 : index
    %145 = vector.load %arg15[%c0_112, %c0_113, %c0_114] : memref<2x18x144xf32, #tpu.memory_space<vmem>>, vector<2x16x144xf32>
    %146 = vector.shape_cast %145 : vector<2x16x144xf32> to vector<32x144xf32>
    %147 = arith.truncf %146 : vector<32x144xf32> to vector<32x144xbf16>
    %c0_115 = arith.constant 0 : index
    %c0_116 = arith.constant 0 : index
    %c0_117 = arith.constant 0 : index
    %148 = vector.load %arg7[%c0_115, %c0_116, %c0_117] : memref<3x144x128xbf16, #tpu.memory_space<vmem>>, vector<1x144x128xbf16>
    %149 = vector.shape_cast %148 : vector<1x144x128xbf16> to vector<144x128xbf16>
    %cst_118 = arith.constant dense<0.000000e+00> : vector<32x128xf32>
    %150 = tpu.matmul %147, %149, %cst_118 {dimension_numbers = #tpu.dot_dimension_numbers<[1], [0], [0], [1], [0, 0, 1, 1], [], []>} : vector<32x144xbf16>, vector<144x128xbf16>, vector<32x128xf32> -> vector<32x128xf32>
    %151 = arith.addf %144, %150 : vector<32x128xf32>
    %c0_119 = arith.constant 0 : index
    %c1_120 = arith.constant 1 : index
    %c0_121 = arith.constant 0 : index
    %152 = vector.load %arg15[%c0_119, %c1_120, %c0_121] : memref<2x18x144xf32, #tpu.memory_space<vmem>>, vector<2x16x144xf32>
    %153 = vector.shape_cast %152 : vector<2x16x144xf32> to vector<32x144xf32>
    %154 = arith.truncf %153 : vector<32x144xf32> to vector<32x144xbf16>
    %c1_122 = arith.constant 1 : index
    %c0_123 = arith.constant 0 : index
    %c0_124 = arith.constant 0 : index
    %155 = vector.load %arg7[%c1_122, %c0_123, %c0_124] : memref<3x144x128xbf16, #tpu.memory_space<vmem>>, vector<1x144x128xbf16>
    %156 = vector.shape_cast %155 : vector<1x144x128xbf16> to vector<144x128xbf16>
    %cst_125 = arith.constant dense<0.000000e+00> : vector<32x128xf32>
    %157 = tpu.matmul %154, %156, %cst_125 {dimension_numbers = #tpu.dot_dimension_numbers<[1], [0], [0], [1], [0, 0, 1, 1], [], []>} : vector<32x144xbf16>, vector<144x128xbf16>, vector<32x128xf32> -> vector<32x128xf32>
    %158 = arith.addf %151, %157 : vector<32x128xf32>
    %c0_126 = arith.constant 0 : index
    %c2_127 = arith.constant 2 : index
    %c0_128 = arith.constant 0 : index
    %159 = vector.load %arg15[%c0_126, %c2_127, %c0_128] : memref<2x18x144xf32, #tpu.memory_space<vmem>>, vector<2x16x144xf32>
    %160 = vector.shape_cast %159 : vector<2x16x144xf32> to vector<32x144xf32>
    %161 = arith.truncf %160 : vector<32x144xf32> to vector<32x144xbf16>
    %c2_129 = arith.constant 2 : index
    %c0_130 = arith.constant 0 : index
    %c0_131 = arith.constant 0 : index
    %162 = vector.load %arg7[%c2_129, %c0_130, %c0_131] : memref<3x144x128xbf16, #tpu.memory_space<vmem>>, vector<1x144x128xbf16>
    %163 = vector.shape_cast %162 : vector<1x144x128xbf16> to vector<144x128xbf16>
    %cst_132 = arith.constant dense<0.000000e+00> : vector<32x128xf32>
    %164 = tpu.matmul %161, %163, %cst_132 {dimension_numbers = #tpu.dot_dimension_numbers<[1], [0], [0], [1], [0, 0, 1, 1], [], []>} : vector<32x144xbf16>, vector<144x128xbf16>, vector<32x128xf32> -> vector<32x128xf32>
    %165 = arith.addf %158, %164 : vector<32x128xf32>
    %cst_133 = arith.constant dense<0.000000e+00> : vector<128xf32>
    %166 = vector.multi_reduction <add>, %165, %cst_133 [0] : vector<32x128xf32> to vector<128xf32>
    %167 = vector.shape_cast %166 : vector<128xf32> to vector<1x128xf32>
    %c8_i32_134 = arith.constant 8 : i32
    %168 = tpu.dynamic_rotate %167 by %c8_i32_134 dim 1 : vector<1x128xf32>, i32 -> vector<1x128xf32>
    %169 = arith.addf %167, %168 : vector<1x128xf32>
    %c16_i32_135 = arith.constant 16 : i32
    %170 = tpu.dynamic_rotate %169 by %c16_i32_135 dim 1 : vector<1x128xf32>, i32 -> vector<1x128xf32>
    %171 = arith.addf %169, %170 : vector<1x128xf32>
    %c32_i32_136 = arith.constant 32 : i32
    %172 = tpu.dynamic_rotate %171 by %c32_i32_136 dim 1 : vector<1x128xf32>, i32 -> vector<1x128xf32>
    %173 = arith.addf %171, %172 : vector<1x128xf32>
    %c64_i32_137 = arith.constant 64 : i32
    %174 = tpu.dynamic_rotate %173 by %c64_i32_137 dim 1 : vector<1x128xf32>, i32 -> vector<1x128xf32>
    %175 = arith.addf %173, %174 : vector<1x128xf32>
    %cst_138 = arith.constant 0.001953125 : f32
    %176 = vector.broadcast %cst_138 : f32 to vector<1x128xf32>
    %177 = arith.mulf %175, %176 : vector<1x128xf32>
    %178 = vector.broadcast %177 : vector<1x128xf32> to vector<32x128xf32>
    %179 = arith.subf %165, %178 : vector<32x128xf32>
    %180 = arith.mulf %179, %179 : vector<32x128xf32>
    %cst_139 = arith.constant dense<0.000000e+00> : vector<128xf32>
    %181 = vector.multi_reduction <add>, %180, %cst_139 [0] : vector<32x128xf32> to vector<128xf32>
    %182 = vector.shape_cast %181 : vector<128xf32> to vector<1x128xf32>
    %c8_i32_140 = arith.constant 8 : i32
    %183 = tpu.dynamic_rotate %182 by %c8_i32_140 dim 1 : vector<1x128xf32>, i32 -> vector<1x128xf32>
    %184 = arith.addf %182, %183 : vector<1x128xf32>
    %c16_i32_141 = arith.constant 16 : i32
    %185 = tpu.dynamic_rotate %184 by %c16_i32_141 dim 1 : vector<1x128xf32>, i32 -> vector<1x128xf32>
    %186 = arith.addf %184, %185 : vector<1x128xf32>
    %c32_i32_142 = arith.constant 32 : i32
    %187 = tpu.dynamic_rotate %186 by %c32_i32_142 dim 1 : vector<1x128xf32>, i32 -> vector<1x128xf32>
    %188 = arith.addf %186, %187 : vector<1x128xf32>
    %c64_i32_143 = arith.constant 64 : i32
    %189 = tpu.dynamic_rotate %188 by %c64_i32_143 dim 1 : vector<1x128xf32>, i32 -> vector<1x128xf32>
    %190 = arith.addf %188, %189 : vector<1x128xf32>
    %cst_144 = arith.constant 0.001953125 : f32
    %191 = vector.broadcast %cst_144 : f32 to vector<1x128xf32>
    %192 = arith.mulf %190, %191 : vector<1x128xf32>
    %c0_145 = arith.constant 0 : index
    %c0_146 = arith.constant 0 : index
    %193 = vector.load %arg8[%c0_145, %c0_146] : memref<1x128xf32, #tpu.memory_space<vmem>>, vector<1x128xf32>
    %cst_147 = arith.constant 9.99999974E-6 : f32
    %194 = vector.broadcast %cst_147 : f32 to vector<1x128xf32>
    %195 = arith.addf %192, %194 : vector<1x128xf32>
    %196 = math.rsqrt %195 : vector<1x128xf32>
    %197 = arith.mulf %193, %196 : vector<1x128xf32>
    %198 = vector.broadcast %197 : vector<1x128xf32> to vector<32x128xf32>
    %199 = arith.mulf %179, %198 : vector<32x128xf32>
    %c0_148 = arith.constant 0 : index
    %c0_149 = arith.constant 0 : index
    %200 = vector.load %arg9[%c0_148, %c0_149] : memref<1x128xf32, #tpu.memory_space<vmem>>, vector<1x128xf32>
    %201 = vector.broadcast %200 : vector<1x128xf32> to vector<32x128xf32>
    %202 = arith.addf %199, %201 : vector<32x128xf32>
    %c0_150 = arith.constant 0 : index
    %c0_151 = arith.constant 0 : index
    %c0_152 = arith.constant 0 : index
    %203 = vector.load %arg0[%c0_150, %c0_151, %c0_152] : memref<2x16x64xf32, #tpu.memory_space<vmem>>, vector<2x16x64xf32>
    %204 = vector.shape_cast %203 : vector<2x16x64xf32> to vector<32x64xf32>
    %205 = arith.truncf %204 : vector<32x64xf32> to vector<32x64xbf16>
    %c0_153 = arith.constant 0 : index
    %c0_154 = arith.constant 0 : index
    %206 = vector.load %arg10[%c0_153, %c0_154] : memref<64x128xbf16, #tpu.memory_space<vmem>>, vector<64x128xbf16>
    %cst_155 = arith.constant dense<0.000000e+00> : vector<32x128xf32>
    %207 = tpu.matmul %205, %206, %cst_155 {dimension_numbers = #tpu.dot_dimension_numbers<[1], [0], [0], [1], [0, 0, 1, 1], [], []>} : vector<32x64xbf16>, vector<64x128xbf16>, vector<32x128xf32> -> vector<32x128xf32>
    %cst_156 = arith.constant dense<0.000000e+00> : vector<128xf32>
    %208 = vector.multi_reduction <add>, %207, %cst_156 [0] : vector<32x128xf32> to vector<128xf32>
    %209 = vector.shape_cast %208 : vector<128xf32> to vector<1x128xf32>
    %c8_i32_157 = arith.constant 8 : i32
    %210 = tpu.dynamic_rotate %209 by %c8_i32_157 dim 1 : vector<1x128xf32>, i32 -> vector<1x128xf32>
    %211 = arith.addf %209, %210 : vector<1x128xf32>
    %c16_i32_158 = arith.constant 16 : i32
    %212 = tpu.dynamic_rotate %211 by %c16_i32_158 dim 1 : vector<1x128xf32>, i32 -> vector<1x128xf32>
    %213 = arith.addf %211, %212 : vector<1x128xf32>
    %c32_i32_159 = arith.constant 32 : i32
    %214 = tpu.dynamic_rotate %213 by %c32_i32_159 dim 1 : vector<1x128xf32>, i32 -> vector<1x128xf32>
    %215 = arith.addf %213, %214 : vector<1x128xf32>
    %c64_i32_160 = arith.constant 64 : i32
    %216 = tpu.dynamic_rotate %215 by %c64_i32_160 dim 1 : vector<1x128xf32>, i32 -> vector<1x128xf32>
    %217 = arith.addf %215, %216 : vector<1x128xf32>
    %cst_161 = arith.constant 0.001953125 : f32
    %218 = vector.broadcast %cst_161 : f32 to vector<1x128xf32>
    %219 = arith.mulf %217, %218 : vector<1x128xf32>
    %220 = vector.broadcast %219 : vector<1x128xf32> to vector<32x128xf32>
    %221 = arith.subf %207, %220 : vector<32x128xf32>
    %222 = arith.mulf %221, %221 : vector<32x128xf32>
    %cst_162 = arith.constant dense<0.000000e+00> : vector<128xf32>
    %223 = vector.multi_reduction <add>, %222, %cst_162 [0] : vector<32x128xf32> to vector<128xf32>
    %224 = vector.shape_cast %223 : vector<128xf32> to vector<1x128xf32>
    %c8_i32_163 = arith.constant 8 : i32
    %225 = tpu.dynamic_rotate %224 by %c8_i32_163 dim 1 : vector<1x128xf32>, i32 -> vector<1x128xf32>
    %226 = arith.addf %224, %225 : vector<1x128xf32>
    %c16_i32_164 = arith.constant 16 : i32
    %227 = tpu.dynamic_rotate %226 by %c16_i32_164 dim 1 : vector<1x128xf32>, i32 -> vector<1x128xf32>
    %228 = arith.addf %226, %227 : vector<1x128xf32>
    %c32_i32_165 = arith.constant 32 : i32
    %229 = tpu.dynamic_rotate %228 by %c32_i32_165 dim 1 : vector<1x128xf32>, i32 -> vector<1x128xf32>
    %230 = arith.addf %228, %229 : vector<1x128xf32>
    %c64_i32_166 = arith.constant 64 : i32
    %231 = tpu.dynamic_rotate %230 by %c64_i32_166 dim 1 : vector<1x128xf32>, i32 -> vector<1x128xf32>
    %232 = arith.addf %230, %231 : vector<1x128xf32>
    %cst_167 = arith.constant 0.001953125 : f32
    %233 = vector.broadcast %cst_167 : f32 to vector<1x128xf32>
    %234 = arith.mulf %232, %233 : vector<1x128xf32>
    %c0_168 = arith.constant 0 : index
    %c0_169 = arith.constant 0 : index
    %235 = vector.load %arg11[%c0_168, %c0_169] : memref<1x128xf32, #tpu.memory_space<vmem>>, vector<1x128xf32>
    %cst_170 = arith.constant 9.99999974E-6 : f32
    %236 = vector.broadcast %cst_170 : f32 to vector<1x128xf32>
    %237 = arith.addf %234, %236 : vector<1x128xf32>
    %238 = math.rsqrt %237 : vector<1x128xf32>
    %239 = arith.mulf %235, %238 : vector<1x128xf32>
    %240 = vector.broadcast %239 : vector<1x128xf32> to vector<32x128xf32>
    %241 = arith.mulf %221, %240 : vector<32x128xf32>
    %c0_171 = arith.constant 0 : index
    %c0_172 = arith.constant 0 : index
    %242 = vector.load %arg12[%c0_171, %c0_172] : memref<1x128xf32, #tpu.memory_space<vmem>>, vector<1x128xf32>
    %243 = vector.broadcast %242 : vector<1x128xf32> to vector<32x128xf32>
    %244 = arith.addf %241, %243 : vector<32x128xf32>
    %245 = arith.addf %202, %244 : vector<32x128xf32>
    %cst_173 = arith.constant 0.000000e+00 : f32
    %246 = vector.broadcast %cst_173 : f32 to vector<32x128xf32>
    %247 = arith.maximumf %245, %246 : vector<32x128xf32>
    %c0_174 = arith.constant 0 : index
    %c0_175 = arith.constant 0 : index
    %248 = vector.load %arg13[%c0_174, %c0_175] : memref<32x128xf32, #tpu.memory_space<vmem>>, vector<32x128xf32>
    tpu.vector_store %arg13[%c0_174, %c0_175], %247 {strides = array<i32>} : memref<32x128xf32, #tpu.memory_space<vmem>>, vector<32x128xf32>,
    return
  }
}

</mosaic_0001>

<bundles_post_ra>
// kernel: tpu_custom_call.1
= control target key start
LH: loop header
LB: loop body
LE: loop exit
PB: predicated region body
PF: predicated region fallthrough
CT: control target
= control target key end

     0   :  { %18 = vsyncpa [#allocation5], 0  ;;  %s2929_s0 = inlined_call_operand.hbm [shape: f32[2,16,64], index: 0, kind: input, shape index: {}]   ;;  %s2930_s1 = inlined_call_operand.hbm [shape: bf16[3,72,128], index: 1, kind: input, shape index: {}]   ;;  %s2931_s2 = inlined_call_operand.vmem [shape: f32[1,128], index: 2, kind: input, shape index: {}]   ;;  %s2932_s3 = inlined_call_operand.vmem [shape: f32[1,128], index: 3, kind: input, shape index: {}]   ;;  %s2933_s4 = inlined_call_operand.hbm [shape: bf16[3,144,128], index: 4, kind: input, shape index: {}]   ;;  %s2934_s5 = inlined_call_operand.vmem [shape: f32[1,128], index: 5, kind: input, shape index: {}]   ;;  %s2935_s6 = inlined_call_operand.vmem [shape: f32[1,128], index: 6, kind: input, shape index: {}]   ;;  %s2936_s7 = inlined_call_operand.hbm [shape: bf16[3,144,128], index: 7, kind: input, shape index: {}]   ;;  %s2937_s8 = inlined_call_operand.vmem [shape: f32[1,128], index: 8, kind: input, shape index: {}]   ;;  %s2938_s9 = inlined_call_operand.vmem [shape: f32[1,128], index: 9, kind: input, shape index: {}]   ;;  %s2939_s10 = inlined_call_operand.hbm [shape: bf16[64,128], index: 10, kind: input, shape index: {}]   ;;  %s2940_s11 = inlined_call_operand.vmem [shape: f32[1,128], index: 11, kind: input, shape index: {}]   ;;  %s2941_s12 = inlined_call_operand.vmem [shape: f32[1,128], index: 12, kind: input, shape index: {}]   ;;  %s2942_s13 = inlined_call_operand.hbm [shape: f32[32,128], index: 13, kind: output, shape index: {}]  }
   0x1   :  { %19 = vsyncpa [#allocation8], 0 }
   0x2   :  { %20 = vsyncpa [#allocation11], 0 }
   0x3   :  { %21 = vsyncpa [#allocation6], 0  ;;  %s2441_s25 = smov [#allocation7]  }
   0x4   :  { %s39_s26 = sshll.u32 %s2441_s25, 4  ;;  %s40_s26 = int_to_ptr.vmem [resolvable:$true] %s39_s26 }
   0x5   :  { %s2321_s27 = scalar_lea.vmem %s40_s26, 1728  ;;  %p2326_p1 = scmp.lt.s32.totalorder %s40_s26, %s40_s26 }
   0x6   :  { %p2322_p0 = scmp.ne.s32.totalorder %s40_s26, %s2321_s27  ;;  %p2327_p2 = scmp.lt.s32.totalorder %s2321_s27, %s2321_s27 }
   0x8   :  { %p2328_p3 = por %p2327_p2, %p2326_p1 }
   0xa   :  { %p2329_p4 = pnand %p2328_p3, %p2322_p0 }
   0xc   :  { %2332 = shalt.err (!%p2329_p4)
}
   0xd   :  { %s2442_s28 = smov 64   ;;  %s2443_s29 = smov 4  }
   0xe   :  { %45 = dma.hbm_to_vmem [thread:$0]  %s2930_s1, 1728, %s40_s26, [#allocation8], %s2442_s28, %s2442_s28, %s2443_s29  }
   0xf   :  { %s2444_s15 = smov [#allocation10]   ;;  %s2445_s17 = smov [#allocation4]  }
  0x10   :  { %s71_s16 = sshll.u32 %s2444_s15, 4  ;;  %s27_s18 = sshll.u32 %s2445_s17, 4  ;;  %s72_s16 = int_to_ptr.vmem [resolvable:$true] %s71_s16  ;;  %s28_s18 = int_to_ptr.vmem [resolvable:$true] %s27_s18 }
  0x11   :  { %s2341_s19 = scalar_lea.vmem %s72_s16, 3456  ;;  %p2346_p6 = scmp.lt.s32.totalorder %s72_s16, %s72_s16 }
  0x12   :  { %p2342_p5 = scmp.ne.s32.totalorder %s72_s16, %s2341_s19  ;;  %p2347_p7 = scmp.lt.s32.totalorder %s2341_s19, %s2341_s19 }
  0x14   :  { %p2348_p8 = por %p2347_p7, %p2346_p6 }
  0x16   :  { %p2349_p9 = pnand %p2348_p8, %p2342_p5 }
  0x18   :  { %2352 = shalt.err (!%p2349_p9)
}
  0x19   :  { %77 = dma.hbm_to_vmem [thread:$0]  %s2936_s7, 3456, %s72_s16, [#allocation11], %s2442_s28, %s2442_s28, %s2443_s29  }
  0x1a   :  { %s2361_s1 = scalar_lea.vmem %s28_s18, 512  ;;  %p2366_p11 = scmp.lt.s32.totalorder %s28_s18, %s28_s18 }
  0x1b   :  { %p2362_p10 = scmp.ne.s32.totalorder %s28_s18, %s2361_s1  ;;  %p2367_p12 = scmp.lt.s32.totalorder %s2361_s1, %s2361_s1 }
  0x1d   :  { %p2368_p13 = por %p2367_p12, %p2366_p11 }
  0x1f   :  { %p2369_p0 = pnand %p2368_p13, %p2362_p10 }
  0x21   :  { %2372 = shalt.err (!%p2369_p0)
}
  0x22   :  { %s2446_s22 = smov 128   ;;  %s2447_s23 = smov 8  }
  0x23   :  { %33 = dma.hbm_to_vmem [thread:$0]  %s2929_s0, 512, %s28_s18, [#allocation5], %s2446_s22, %s2446_s22, %s2447_s23  }
  0x24   :  { %s2448_s26 = smov [#allocation9]   ;;  %s2449_s7 = smov [#allocation12]  }
  0x25   :  { %s55_s27 = sshll.u32 %s2448_s26, 4  ;;  %s87_s30 = sshll.u32 %s2449_s7, 4  ;;  %s56_s27 = int_to_ptr.vmem [resolvable:$true] %s55_s27  ;;  %s88_s30 = int_to_ptr.vmem [resolvable:$true] %s87_s30 }
  0x26   :  { %s2381_s14 = scalar_lea.vmem %s56_s27, 3456  ;;  %p2386_p2 = scmp.lt.s32.totalorder %s56_s27, %s56_s27 }
  0x27   :  { %p2382_p1 = scmp.ne.s32.totalorder %s56_s27, %s2381_s14  ;;  %p2387_p3 = scmp.lt.s32.totalorder %s2381_s14, %s2381_s14 }
  0x29   :  { %p2388_p4 = por %p2387_p3, %p2386_p2 }
  0x2b   :  { %p2389_p5 = pnand %p2388_p4, %p2382_p1 }
  0x2d   :  { %2392 = shalt.err (!%p2389_p5)
}
  0x2e   :  { %61 = dma.hbm_to_vmem [thread:$0]  %s2933_s4, 3456, %s56_s27, [#allocation8], %s2442_s28, %s2442_s28, %s2443_s29  }
  0x2f   :  { %s2401_s0 = scalar_lea.vmem %s88_s30, 512  ;;  %p2406_p7 = scmp.lt.s32.totalorder %s88_s30, %s88_s30 }
  0x30   :  { %p2402_p6 = scmp.ne.s32.totalorder %s88_s30, %s2401_s0  ;;  %p2407_p8 = scmp.lt.s32.totalorder %s2401_s0, %s2401_s0 }
  0x32   :  { %p2408_p9 = por %p2407_p8, %p2406_p7 }
  0x34   :  { %p2409_p10 = pnand %p2408_p9, %p2402_p6 }
  0x36   :  { %2412 = shalt.err (!%p2409_p10)
}
  0x37   :  { %93 = dma.hbm_to_vmem [thread:$0]  %s2939_s10, 512, %s88_s30, [#allocation11], %s2442_s28, %s2442_s28, %s2443_s29  }
  0x38   :  { %2433 = dma.done.wait [#allocation5], 512  }
  0x39   :  { %2434 = vsyncadd [#allocation5], 4294966784 }
  0x3a   :  { %2435 = dma.done.wait [#allocation8], 5184  }
  0x3b   :  { %2436 = vsyncadd [#allocation8], 4294962112 }
  0x3c   :  { %2437 = dma.done.wait [#allocation11], 3968  }
  0x3d   :  { %2438 = vsyncadd [#allocation11], 4294963328  ;;  %vm119_vm0 = vcmask 31744   ;;  %vm124_vm1 = vcmask 589344   ;;  %v2450_v0 = vmov 0.0   ;;  %vm114_vm2 = vcmask 581632  }
  0x3e   :  { %122 = vst.msk [vmem:[#allocation2 + $0x19] sm:$0xff] %vm119_vm0, %v2450_v0  ;;  %120 = vst.msk [vmem:[#allocation2 + $0x1] sm:$0xff] %vm119_vm0, %v2450_v0  ;;  %v164_v1 = vld [vmem:[#allocation4 + $0x10] sm:$0xff]  ;;  %v162_v2 = vld [vmem:[#allocation4] sm:$0xff]  ;;  %vm252_vm3 = vcmask 1043456   ;;  %vm182_vm4 = vcmask 556064  }
  0x3f   :  { %121 = vst.msk [vmem:[#allocation2 + $0x9] sm:$0xff] %vm119_vm0, %v2450_v0  ;;  %123 = vst.msk [vmem:[#allocation2 + $0x21] sm:$0xff] %vm119_vm0, %v2450_v0  ;;  %v165_v3 = vld [vmem:[#allocation4 + $0x18] sm:$0xff]  ;;  %174 = vrot.lane.b32.xlu1 %v164_v1, %s2443_s29  ;;  %170 = vrot.lane.b32.xlu0 %v162_v2, %s2443_s29  ;;  %v163_v4 = vld [vmem:[#allocation4 + $0x8] sm:$0xff]  ;;  %vm245_vm5 = vcmask 588800   ;;  %s2451_s4 = smov 16  }
  0x40   :  { %127 = vst.msk [vmem:[#allocation2 + $0x19] sm:$0xff] %vm124_vm1, %v2450_v0  ;;  %125 = vst.msk [vmem:[#allocation2 + $0x1] sm:$0xff] %vm124_vm1, %v2450_v0  ;;  %v2232_v5 = vld [vmem:[#allocation7 + $0x44] ss:$0 sps:$4 sm:$0xff]   ;;  %v2233_v6 = vld [vmem:[#allocation7 + $0x20] ss:$0 sps:$4 sm:$0xff]  }
  0x41   :  { %126 = vst.msk [vmem:[#allocation2 + $0x9] sm:$0xff] %vm124_vm1, %v2450_v0  ;;  %128 = vst.msk [vmem:[#allocation2 + $0x21] sm:$0xff] %vm124_vm1, %v2450_v0  ;;  %2215 = vmatprep.subr.msk.bf16.mxu0 %vm252_vm3, %v2232_v5  ;;  %v254_v7 = vsel %vm252_vm3, %v2232_v5, 0  ;;  %v2234_v8 = vld [vmem:[#allocation7 + $0x3c] sm:$0xff]   ;;  %2216 = vmatprep.subr.msk.bf16.mxu1 %vm252_vm3, %v2233_v6  ;;  %v339_v9 = vsel %vm252_vm3, %v2233_v6, 0  ;;  %v2236_v11 = vld [vmem:[#allocation7 + $0x34] sm:$0xff]  }
  0x42   :  { %115 = vst.msk [vmem:[#allocation2] sm:$0x1] %vm114_vm2, %v2450_v0  ;;  %118 = vst.msk [vmem:[#allocation2 + $0x29] sm:$0x1] %vm114_vm2, %v2450_v0  ;;  %2162 = vmatpush3.bf16.msra.mxu0 %v254_v7  ;;  %v2235_v10 = vld [vmem:[#allocation7 + $0x18] sm:$0xff]   ;;  %2176 = vmatpush3.bf16.msra.mxu1 %v339_v9  ;;  %v2237_v12 = vld [vmem:[#allocation7 + $0x10] sm:$0xff]  }
  0x43   :  { %116 = vst.msk [vmem:[#allocation2 + $0x18] sm:$0x1] %vm114_vm2, %v2450_v0  ;;  %117 = vst.msk [vmem:[#allocation2 + $0x11] sm:$0x1] %vm114_vm2, %v2450_v0  ;;  %176 = vrot.lane.b32.xlu1 %v165_v3, %s2443_s29  ;;  %172 = vrot.lane.b32.xlu0 %v163_v4, %s2443_s29  ;;  %v2238_v13 = vld [vmem:[#allocation7 + $0x2c] sm:$0xff]   ;;  %v2240_v16 = vld [vmem:[#allocation7 + $0x24] sm:$0xff]  }
  0x44   :  { %2163 = vmatprep.subr.bf16.mxu0 %v2234_v8  ;;  %2177 = vmatprep.subr.bf16.mxu1 %v2235_v10  ;;  %v2239_v14 = vld [vmem:[#allocation7 + $0x8] sm:$0xff]   ;;  %v2241_v18 = vld [vmem:[#allocation7] sm:$0xff]   ;;  %v2244_v39 = vld [vmem:[#allocation7 + $0x58] sm:$0xff]   ;;  %s2452_s10 = smov 32   ;;  %vm144_vm7 = vcmask 64513   ;;  %vm153_vm8 = vcmask 130113  }
  0x45   :  { %v2242_v15 = vld [vmem:[#allocation7 + $0x68] ss:$0 sps:$4 sm:$0xff]   ;;  %v2243_v37 = vld [vmem:[#allocation7 + $0x60] sm:$0xff]   ;;  %v2245_v40 = vld [vmem:[#allocation7 + $0x50] sm:$0xff]   ;;  %145 = vst.msk [vmem:[#allocation3] sm:$0xfe] %vm144_vm7, %v2450_v0 }
  0x46   :  { %2164 = vmatpush3.bf16.msra.mxu0 %v2234_v8  ;;  %2178 = vmatpush3.bf16.msra.mxu1 %v2235_v10  ;;  %v440_v17 = vsel %vm252_vm3, %v2242_v15, 0  ;;  %v2246_v41 = vld [vmem:[#allocation7 + $0x48] sm:$0xff]   ;;  %154 = vst.msk [vmem:[#allocation3 + $0x8] sm:$0xfe] %vm153_vm8, %v2450_v0  ;;  %159 = vst.msk [vmem:[#allocation3 + $0x38] sm:$0xfe] %vm153_vm8, %v2450_v0 }
  0x47   :  { %2165 = vmatprep.subr.bf16.mxu0 %v2236_v11  ;;  %2179 = vmatprep.subr.bf16.mxu1 %v2237_v12  ;;  %150 = vst.msk [vmem:[#allocation3 + $0x30] sm:$0xfe] %vm144_vm7, %v2450_v0  ;;  %vm146_vm9 = vcmask 64512   ;;  %vm155_vm10 = vcmask 130112   ;;  %vm148_vm11 = vcmask 57344   ;;  %vm157_vm12 = vcmask 122944  }
  0x48   :  { %147 = vst.msk [vmem:[#allocation3 + $0x10] sm:$0xff] %vm146_vm9, %v2450_v0  ;;  %151 = vst.msk [vmem:[#allocation3 + $0x40] sm:$0xff] %vm146_vm9, %v2450_v0  ;;  %vm584_vm13 = vcmask 1040384   ;;  %vm609_vm14 = vcmask 1047617   ;;  %vm612_vm15 = vcmask 1047616   ;;  %vm615_vm0 = vcmask 1040448  }
  0x49   :  { %156 = vst.msk [vmem:[#allocation3 + $0x18] sm:$0xff] %vm155_vm10, %v2450_v0  ;;  %160 = vst.msk [vmem:[#allocation3 + $0x48] sm:$0xff] %vm155_vm10, %v2450_v0  ;;  %vm780_vm1 = vcmask 130048   ;;  %vm674_vm2 = vcmask 1046528  }
  0x4a   :  { %2166 = vmatpush3.bf16.msra.mxu0 %v2236_v11  ;;  %2180 = vmatpush3.bf16.msra.mxu1 %v2237_v12  ;;  %149 = vst.msk [vmem:[#allocation3 + $0x20] sm:$0x1] %vm148_vm11, %v2450_v0  ;;  %152 = vst.msk [vmem:[#allocation3 + $0x50] sm:$0x1] %vm148_vm11, %v2450_v0 }
  0x4b   :  { %2167 = vmatprep.subr.bf16.mxu0 %v2238_v13  ;;  %2181 = vmatprep.subr.bf16.mxu1 %v2239_v14  ;;  %158 = vst.msk [vmem:[#allocation3 + $0x28] sm:$0x1] %vm157_vm12, %v2450_v0  ;;  %161 = vst.msk [vmem:[#allocation3 + $0x58] sm:$0x1] %vm157_vm12, %v2450_v0 }
  0x4e   :  { %2168 = vmatpush3.bf16.msra.mxu0 %v2238_v13  ;;  %2182 = vmatpush3.bf16.msra.mxu1 %v2239_v14  ;;  %v129_v13 = vlaneseq }
  0x4f   :  { %2169 = vmatprep.subr.bf16.mxu0 %v2240_v16  ;;  %2183 = vmatprep.subr.bf16.mxu1 %v2241_v18 }
  0x50   :  { %vm131_vm6 = vcmp.lt.s32.totalorder %v129_v13, 144 }
  0x51   :  { %139 = vst.msk [vmem:[#allocation3 + $0x21] ss:$8 sm:$0x3] %vm131_vm6, %v2450_v0  ;;  %142 = vst.msk [vmem:[#allocation3 + $0x51] ss:$8 sm:$0x3] %vm131_vm6, %v2450_v0 }
  0x52   :  { %2170 = vmatpush3.bf16.msra.mxu0 %v2240_v16  ;;  %2184 = vmatpush3.bf16.msra.mxu1 %v2241_v18  ;;  %133 = vst.msk [vmem:[#allocation3] ss:$8 sm:$0x3] %vm131_vm6, %v2450_v0  ;;  %136 = vst.msk [vmem:[#allocation3 + $0x30] ss:$8 sm:$0x3] %vm131_vm6, %v2450_v0 }
  0x53   :  { %2217 = vmatprep.subr.msk.bf16.mxu0 %vm252_vm3, %v2242_v15  ;;  %v518_v18 = vshrl.u32 %v129_v13, 7  ;;  %vm961_vm3 = vcmask 1045504  }
  0xb1   :  { %v175_v19 = vpop.permute.xlu1 %174  ;;  %v171_v20 = vpop.permute.xlu0 %170 }
  0xb2   :  { %185 = vst.msk [vmem:[#allocation2 + $0x19] sm:$0xff] %vm182_vm4, %v175_v19  ;;  %183 = vst.msk [vmem:[#allocation2 + $0x1] sm:$0xff] %vm182_vm4, %v171_v20  ;;  %v2591_v20 = vsub.s32 0, %v518_v18 }
  0xb5   :  { %v177_v21 = vpop.permute.xlu1 %176  ;;  %v173_v22 = vpop.permute.xlu0 %172 }
  0xb6   :  { %186 = vst.msk [vmem:[#allocation2 + $0x21] sm:$0xff] %vm182_vm4, %v177_v21  ;;  %184 = vst.msk [vmem:[#allocation2 + $0x9] sm:$0xff] %vm182_vm4, %v173_v22  ;;  %vm1869_vm4 = vcmask 523264  }
  0xb9   :  { %v202_v23 = vld [vmem:[#allocation2 + $0x1] sm:$0xff]  ;;  %v204_v25 = vld [vmem:[#allocation2 + $0x19] sm:$0xff] }
  0xba   :  { %v187_v24 = vld [vmem:[#allocation2] sm:$0xff]  ;;  %v189_v26 = vld [vmem:[#allocation2 + $0x18] sm:$0xff] }
  0xbd   :  { %v203_v27 = vld [vmem:[#allocation2 + $0x9] sm:$0xff]  ;;  %v205_v29 = vld [vmem:[#allocation2 + $0x21] sm:$0xff] }
  0xbe   :  { %v188_v28 = vld [vmem:[#allocation2 + $0x8] sm:$0xff]  ;;  %v206_v30 = vpack.c.bf16 %v203_v27, %v202_v23  ;;  %v207_v32 = vpack.c.bf16 %v205_v29, %v204_v25  ;;  %v190_v33 = vld [vmem:[#allocation2 + $0x20] sm:$0xff] }
  0xbf   :  { %v191_v31 = vpack.c.bf16 %v188_v28, %v187_v24  ;;  %v390_v34 = vld [vmem:[#allocation2 + $0x2] sm:$0xff]  ;;  %v391_v35 = vld [vmem:[#allocation2 + $0xa] sm:$0xff]  ;;  %v192_v36 = vpack.c.bf16 %v190_v33, %v189_v26  ;;  %v392_v42 = vld [vmem:[#allocation2 + $0x1a] sm:$0xff] }
  0xc0   :  { %2171 = vmatprep.mubr.msk.bf16.mxu0 %vm245_vm5, %v206_v30  ;;  %v394_v38 = vpack.c.bf16 %v391_v35, %v390_v34  ;;  %v393_v43 = vld [vmem:[#allocation2 + $0x22] sm:$0xff] }
  0xc1   :  { %2185 = vmatprep.mubr.msk.bf16.mxu1 %vm245_vm5, %v191_v31  ;;  %2172 = vmatmul.mubr.msk.bf16.vlgmr.msra.gmra.mxu0 %vm245_vm5, %v207_v32  ;;  %v395_v44 = vpack.c.bf16 %v393_v43, %v392_v42 }
  0xc2   :  { %2186 = vmatmul.mubr.msk.bf16.vlgmr.msra.gmra.mxu1 %vm245_vm5, %v192_v36  ;;  %2190 = vmatpush3.bf16.msra.mxu0 %v440_v17 }
  0xc3   :  { %2199 = vmatprep.mubr.msk.bf16.mxu0 %vm245_vm5, %v394_v38  ;;  %2191 = vmatprep.subr.bf16.mxu0 %v2243_v37 }
  0xc6   :  { %2192 = vmatpush3.bf16.msra.mxu0 %v2243_v37 }
  0xc7   :  { %2193 = vmatprep.subr.bf16.mxu0 %v2244_v39 }
  0xca   :  { %2194 = vmatpush3.bf16.msra.mxu0 %v2244_v39 }
  0xcb   :  { %2195 = vmatprep.subr.bf16.mxu0 %v2245_v40 }
  0xce   :  { %2196 = vmatpush3.bf16.msra.mxu0 %v2245_v40 }
  0xcf   :  { %2197 = vmatprep.subr.bf16.mxu0 %v2246_v41 }
  0xd2   :  { %2198 = vmatpush3.bf16.msra.mxu0 %v2246_v41 }
  0xd5   :  { %2200 = vmatmul.mubr.msk.bf16.vlgmr.msra.gmra.mxu0 %vm245_vm5, %v395_v44 }
 0x181   :  { %v2173_v45 = vpop.f32.mrf.mxu0 }
 0x182   :  { %v2187_v46 = vpop.f32.mrf.mxu1 }
 0x183   :  { %v290_v47 = vpop.f32.mrf.mxu0  ;;  %v384_v59 = vadd.f32 %v2187_v46, %v2173_v45 }
 0x184   :  { %v375_v48 = vpop.f32.mrf.mxu1 }
 0x185   :  { %v2174_v49 = vpop.f32.mrf.mxu0  ;;  %v376_v56 = vadd.f32 %v375_v48, %v290_v47  ;;  %v2247_v47 = vld [vmem:[#allocation9 + $0x38] sm:$0xff]   ;;  %v2249_v48 = vld [vmem:[#allocation9 + $0x80] sm:$0xff]  }
 0x186   :  { %v2188_v50 = vpop.f32.mrf.mxu1 }
 0x187   :  { %v293_v51 = vpop.f32.mrf.mxu0  ;;  %v387_v62 = vadd.f32 %v2188_v50, %v2174_v49  ;;  %v2453_v49 = vmov 0   ;;  %v2248_v50 = vld [vmem:[#allocation9 + $0x30] sm:$0xff]  }
 0x188   :  { %v378_v53 = vpop.f32.mrf.mxu1  ;;  %896 = vmatprep.subr.bf16.mxu0 %v2453_v49  ;;  %787 = vmatprep.subr.bf16.mxu1 %v2453_v49 }
 0x189   :  { %v379_v57 = vadd.f32 %v378_v53, %v293_v51  ;;  %897 = vmatpush1.bf16.msra.mxu0 %v2247_v47  ;;  %788 = vmatpush1.bf16.msra.mxu1 %v2249_v48  ;;  %v2251_v51 = vld [vmem:[#allocation9 + $0x78] sm:$0xff]   ;;  %v2253_v53 = vld [vmem:[#allocation9 + $0x70] sm:$0xff]  }
 0x18a   :  { %898 = vmatprep.subr.bf16.mxu0 %v2453_v49  ;;  %789 = vmatprep.subr.bf16.mxu1 %v2453_v49 }
 0x18d   :  { %899 = vmatpush1.bf16.msra.mxu0 %v2248_v50  ;;  %790 = vmatpush1.bf16.msra.mxu1 %v2251_v51 }
 0x18e   :  { %900 = vmatprep.subr.bf16.mxu0 %v2453_v49  ;;  %791 = vmatprep.subr.bf16.mxu1 %v2453_v49 }
 0x191   :  { %792 = vmatpush1.bf16.msra.mxu1 %v2253_v53 }
 0x192   :  { %793 = vmatprep.subr.bf16.mxu1 %v2453_v49 }
 0x195   :  { %v2201_v52 = vpop.f32.mrf.mxu0 }
 0x196   :  { %v493_v63 = vadd.f32 %v2201_v52, %v384_v59  ;;  %v2250_v52 = vld [vmem:[#allocation9 + $0x28] sm:$0xff]  }
 0x197   :  { %v476_v54 = vpop.f32.mrf.mxu0  ;;  %901 = vmatpush1.bf16.msra.mxu0 %v2250_v52 }
 0x198   :  { %v491_v60 = vadd.f32 %v476_v54, %v376_v56  ;;  %v2252_v54 = vld [vmem:[#allocation9 + $0x20] sm:$0xff]   ;;  %902 = vmatprep.subr.bf16.mxu0 %v2453_v49  ;;  %v2254_v56 = vld [vmem:[#allocation9 + $0x18] sm:$0xff]  }
 0x199   :  { %v2202_v55 = vpop.f32.mrf.mxu0 }
 0x19a   :  { %v494_v2 = vadd.f32 %v2202_v55, %v387_v62  ;;  %v2255_v55 = vld [vmem:[#allocation9 + $0x68] sm:$0xff]  }
 0x19b   :  { %v479_v58 = vpop.f32.mrf.mxu0  ;;  %903 = vmatpush1.bf16.msra.mxu0 %v2252_v54  ;;  %794 = vmatpush1.bf16.msra.mxu1 %v2255_v55 }
 0x19c   :  { %v492_v61 = vadd.f32 %v479_v58, %v379_v57  ;;  %v2257_v57 = vld [vmem:[#allocation9 + $0x60] sm:$0xff]   ;;  %904 = vmatprep.subr.bf16.mxu0 %v2453_v49  ;;  %795 = vmatprep.subr.bf16.mxu1 %v2453_v49  ;;  %v2256_v58 = vld [vmem:[#allocation9 + $0x10] sm:$0xff]  }
 0x19e   :  { %v495_v1 = vadd.f32 %v492_v61, %v491_v60 }
 0x19f   :  { %905 = vmatpush1.bf16.msra.mxu0 %v2254_v56  ;;  %796 = vmatpush1.bf16.msra.mxu1 %v2257_v57 }
 0x1a0   :  { %v496_v3 = vadd.f32 %v495_v1, %v493_v63  ;;  %906 = vmatprep.subr.bf16.mxu0 %v2453_v49  ;;  %797 = vmatprep.subr.bf16.mxu1 %v2453_v49 }
 0x1a2   :  { %v497_v4 = vadd.f32 %v496_v3, %v494_v2 }
 0x1a3   :  { %907 = vmatpush1.bf16.msra.mxu0 %v2256_v58 }
 0x1a4   :  { %v498_v5 = vrot.slane %v497_v4, 4  ;;  %908 = vmatprep.subr.bf16.mxu0 %v2453_v49 }
 0x1a6   :  { %v499_v6 = vadd.f32 %v498_v5, %v497_v4  ;;  %v2259_v4 = vld [vmem:[#allocation9 + $0x58] sm:$0xff]  }
 0x1a7   :  { %798 = vmatpush1.bf16.msra.mxu1 %v2259_v4 }
 0x1a8   :  { %v500_v7 = vrot.slane %v499_v6, 2  ;;  %799 = vmatprep.subr.bf16.mxu1 %v2453_v49 }
 0x1aa   :  { %v501_v8 = vadd.f32 %v500_v7, %v499_v6  ;;  %v2058_v6 = vld [vmem:[%s2932_s3] ss:$0 sm:$0xff] }
 0x1ab   :  { %v2260_v7 = vld [vmem:[#allocation9] sm:$0xff]  }
 0x1ac   :  { %v502_v9 = vrot.slane %v501_v8, 1 }
 0x1ae   :  { %v503_v10 = vadd.f32 %v502_v9, %v501_v8 }
 0x1b0   :  { %504 = vrot.lane.b32.xlu0 %v503_v10, %s2447_s23 }
 0x222   :  { %v505_v11 = vpop.permute.xlu0 %504 }
 0x223   :  { %v506_v12 = vadd.f32 %v505_v11, %v503_v10  ;;  %v2261_v11 = vld [vmem:[#allocation9 + $0x50] sm:$0xff]  }
 0x224   :  { %800 = vmatpush1.bf16.msra.mxu1 %v2261_v11 }
 0x225   :  { %507 = vrot.lane.b32.xlu1 %v506_v12, %s2451_s4  ;;  %801 = vmatprep.subr.bf16.mxu1 %v2453_v49 }
 0x297   :  { %v508_v14 = vpop.permute.xlu1 %507 }
 0x298   :  { %v509_v15 = vadd.f32 %v508_v14, %v506_v12 }
 0x29a   :  { %510 = vrot.lane.b32.xlu0 %v509_v15, %s2452_s10 }
 0x30c   :  { %v511_v16 = vpop.permute.xlu0 %510 }
 0x30d   :  { %v512_v17 = vadd.f32 %v511_v16, %v509_v15  ;;  %v2262_v16 = vld [vmem:[#allocation9 + $0x40] sm:$0xff]  }
 0x30f   :  { %513 = vrot.lane.b32.xlu1 %v512_v17, %s2442_s28 }
 0x381   :  { %v514_v19 = vpop.permute.xlu1 %513 }
 0x382   :  { %v515_v21 = vadd.f32 %v514_v19, %v512_v17  ;;  %v2263_v19 = vld [vmem:[#allocation9 + $0x48] sm:$0xff]  }
 0x383   :  { %802 = vmatpush1.bf16.msra.mxu1 %v2263_v19 }
 0x384   :  { %v516_v22 = vmul.f32 0.001953125, %v515_v21  ;;  %817 = vmatprep.subr.bf16.mxu1 %v2453_v49 }
 0x386   :  { %v520_v23 = vrot.slane %v516_v22, %v2591_v20 }
 0x388   :  { %v2594_v24 = vsub.f32 %v491_v60, %v520_v23  ;;  %v2596_v25 = vsub.f32 %v492_v61, %v520_v23  ;;  %v2598_v26 = vsub.f32 %v493_v63, %v520_v23  ;;  %v2600_v27 = vsub.f32 %v494_v2, %v520_v23  ;;  %v551_v63 = vld [vmem:[%s2931_s2] sm:$0x1]  ;;  %v2258_v2 = vld [vmem:[#allocation9 + $0x8] sm:$0xff]  }
 0x389   :  { %909 = vmatpush1.bf16.msra.mxu0 %v2258_v2 }
 0x38a   :  { %v525_v28 = vmul.f32 %v2594_v24, %v2594_v24  ;;  %v526_v29 = vmul.f32 %v2596_v25, %v2596_v25  ;;  %v527_v30 = vmul.f32 %v2598_v26, %v2598_v26  ;;  %v528_v32 = vmul.f32 %v2600_v27, %v2600_v27  ;;  %910 = vmatprep.subr.bf16.mxu0 %v2453_v49 }
 0x38c   :  { %v529_v31 = vadd.f32 %v526_v29, %v525_v28 }
 0x38d   :  { %911 = vmatpush1.bf16.msra.mxu0 %v2260_v7 }
 0x38e   :  { %v530_v33 = vadd.f32 %v529_v31, %v527_v30  ;;  %926 = vmatprep.subr.bf16.mxu0 %v2453_v49 }
 0x390   :  { %v531_v34 = vadd.f32 %v530_v33, %v528_v32 }
 0x391   :  { %927 = vmatpush2.bf16.msra.mxu0 %v2262_v16  ;;  %v2266_v16 = vld [vmem:[#allocation9 + $0xc0] sm:$0xff]  }
 0x392   :  { %v532_v35 = vrot.slane %v531_v34, 4  ;;  %1412 = vmatprep.subr.bf16.mxu0 %v2453_v49 }
 0x394   :  { %v533_v36 = vadd.f32 %v532_v35, %v531_v34 }
 0x396   :  { %v534_v37 = vrot.slane %v533_v36, 2 }
 0x398   :  { %v535_v38 = vadd.f32 %v534_v37, %v533_v36 }
 0x39a   :  { %v536_v39 = vrot.slane %v535_v38, 1 }
 0x39c   :  { %v537_v40 = vadd.f32 %v536_v39, %v535_v38 }
 0x39e   :  { %538 = vrot.lane.b32.xlu0 %v537_v40, %s2447_s23 }
 0x410   :  { %v539_v41 = vpop.permute.xlu0 %538 }
 0x411   :  { %v540_v42 = vadd.f32 %v539_v41, %v537_v40 }
 0x413   :  { %541 = vrot.lane.b32.xlu1 %v540_v42, %s2451_s4 }
 0x485   :  { %v542_v43 = vpop.permute.xlu1 %541 }
 0x486   :  { %v543_v44 = vadd.f32 %v542_v43, %v540_v42 }
 0x488   :  { %544 = vrot.lane.b32.xlu0 %v543_v44, %s2452_s10 }
 0x4fa   :  { %v545_v45 = vpop.permute.xlu0 %544 }
 0x4fb   :  { %v546_v46 = vadd.f32 %v545_v45, %v543_v44 }
 0x4fd   :  { %547 = vrot.lane.b32.xlu1 %v546_v46, %s2442_s28 }
 0x56f   :  { %v548_v59 = vpop.permute.xlu1 %547 }
 0x570   :  { %v549_v60 = vadd.f32 %v548_v59, %v546_v46  ;;  %v2265_v59 = vld [vmem:[#allocation9 + $0xc8] sm:$0xff]  }
 0x572   :  { %v550_v61 = vmul.f32 0.001953125, %v549_v60 }
 0x574   :  { %v552_v62 = vadd.f32 1e-05, %v550_v61 }
 0x576   :  { %2305 = vrsqrt.f32 %v552_v62 }
 0x583   :  { %v2306_v1 = vpop.eup %2305 }
 0x584   :  { %v554_v3 = vmul.f32 %v2306_v1, %v551_v63 }
 0x586   :  { %v559_v5 = vrot.slane %v554_v3, %v2591_v20 }
 0x588   :  { %v561_v8 = vmul.f32 %v559_v5, %v2594_v24  ;;  %v562_v9 = vmul.f32 %v559_v5, %v2596_v25  ;;  %v563_v10 = vmul.f32 %v559_v5, %v2598_v26  ;;  %v564_v0 = vmul.f32 %v559_v5, %v2600_v27  ;;  %v2264_v25 = vld [vmem:[#allocation9 + $0x88] sm:$0xff]  }
 0x589   :  { %818 = vmatpush2.bf16.msra.mxu1 %v2264_v25  ;;  %v2267_v25 = vld [vmem:[#allocation9 + $0xb8] sm:$0xff]  }
 0x58a   :  { %v572_v12 = vadd.f32 %v2058_v6, %v561_v8  ;;  %v573_v13 = vadd.f32 %v2058_v6, %v562_v9  ;;  %v574_v14 = vadd.f32 %v2058_v6, %v563_v10  ;;  %v575_v15 = vadd.f32 %v2058_v6, %v564_v0  ;;  %1073 = vmatprep.subr.bf16.mxu1 %v2453_v49 }
 0x58c   :  { %v576_v17 = vmax.f32 %v572_v12, 0.0  ;;  %v577_v18 = vmax.f32 %v573_v13, 0.0  ;;  %v578_v23 = vmax.f32 %v574_v14, 0.0  ;;  %v579_v24 = vmax.f32 %v575_v15, 0.0 }
 0x58e   :  { %v585_v21 = vrot.slane %v576_v17, 7  ;;  %v586_v22 = vrot.slane %v577_v18, 7  ;;  %v588_v27 = vrot.slane %v578_v23, 7  ;;  %v589_v28 = vrot.slane %v579_v24, 7 }
 0x590   :  { %591 = vrot.lane.b32.xlu0 %v585_v21, %s2447_s23  ;;  %v587_v26 = vsel %vm584_vm13, %v585_v21, %v586_v22  ;;  %v590_v29 = vsel %vm584_vm13, %v588_v27, %v589_v28 }
 0x591   :  { %593 = vrot.lane.b32.xlu1 %v587_v26, %s2447_s23 }
 0x594   :  { %595 = vrot.lane.b32.xlu0 %v586_v22, %s2447_s23 }
 0x595   :  { %597 = vrot.lane.b32.xlu1 %v588_v27, %s2447_s23 }
 0x598   :  { %599 = vrot.lane.b32.xlu0 %v590_v29, %s2447_s23  ;;  %v2268_v29 = vld [vmem:[#allocation9 + $0xb0] sm:$0xff]  }
 0x599   :  { %601 = vrot.lane.b32.xlu1 %v589_v28, %s2447_s23 }
 0x602   :  { %v592_v30 = vpop.permute.xlu0 %591 }
 0x603   :  { %610 = vst.msk [vmem:[#allocation3] sm:$0xfe] %vm609_vm14, %v592_v30  ;;  %v594_v31 = vpop.permute.xlu1 %593 }
 0x604   :  { %611 = vst.msk [vmem:[#allocation3 + $0x8] sm:$0xfe] %vm144_vm7, %v592_v30  ;;  %v2269_v30 = vld [vmem:[#allocation9 + $0xa8] sm:$0xff]  }
 0x605   :  { %613 = vst.msk [vmem:[#allocation3 + $0x10] sm:$0xff] %vm612_vm15, %v594_v31 }
 0x606   :  { %614 = vst.msk [vmem:[#allocation3 + $0x18] sm:$0xff] %vm146_vm9, %v594_v31  ;;  %v596_v32 = vpop.permute.xlu0 %595  ;;  %v2270_v31 = vld [vmem:[#allocation9 + $0xa0] sm:$0xff]  }
 0x607   :  { %616 = vst.msk [vmem:[#allocation3 + $0x20] sm:$0x1] %vm615_vm0, %v596_v32  ;;  %v598_v33 = vpop.permute.xlu1 %597 }
 0x608   :  { %617 = vst.msk [vmem:[#allocation3 + $0x28] sm:$0x1] %vm148_vm11, %v596_v32  ;;  %v2271_v32 = vld [vmem:[#allocation9 + $0x98] sm:$0xff]  }
 0x609   :  { %618 = vst.msk [vmem:[#allocation3 + $0x30] sm:$0xfe] %vm609_vm14, %v598_v33 }
 0x60a   :  { %619 = vst.msk [vmem:[#allocation3 + $0x38] sm:$0xfe] %vm144_vm7, %v598_v33  ;;  %v600_v34 = vpop.permute.xlu0 %599  ;;  %v624_v36 = vld [vmem:[#allocation3] sm:$0xff] }
 0x60b   :  { %v625_v35 = vld [vmem:[#allocation3 + $0x8] sm:$0xff]  ;;  %620 = vst.msk [vmem:[#allocation3 + $0x40] sm:$0xff] %vm612_vm15, %v600_v34  ;;  %v602_v38 = vpop.permute.xlu1 %601  ;;  %v654_v41 = vld [vmem:[#allocation3] sm:$0xfe] }
 0x60c   :  { %v655_v37 = vld [vmem:[#allocation3 + $0x8] sm:$0xfe]  ;;  %621 = vst.msk [vmem:[#allocation3 + $0x48] sm:$0xff] %vm146_vm9, %v600_v34  ;;  %v2683_v40 = vld [vmem:[#allocation3 + $0x10] sm:$0xff]  ;;  %v675_v46 = vrot.slane %v654_v41, 1  ;;  %v2272_v34 = vld [vmem:[#allocation9 + $0x90] sm:$0xff]  }
 0x60d   :  { %v2681_v39 = vld [vmem:[#allocation3 + $0x18] sm:$0xff]  ;;  %622 = vst.msk [vmem:[#allocation3 + $0x50] sm:$0x1] %vm615_vm0, %v602_v38  ;;  %v632_v43 = vpack.c.bf16 %v2683_v40, %v624_v36  ;;  %v678_v44 = vrot.slane %v655_v37, 1  ;;  %v676_v47 = vrot.slane %v2683_v40, 1 }
 0x60e   :  { %623 = vst.msk [vmem:[#allocation3 + $0x58] sm:$0x1] %vm148_vm11, %v602_v38  ;;  %v633_v42 = vpack.c.bf16 %v2681_v39, %v625_v35  ;;  %v679_v45 = vrot.slane %v2681_v39, 1  ;;  %v656_v50 = vld [vmem:[#allocation3 + $0x20] sm:$0x1]  ;;  %v966_v21 = vrot.slane %v2681_v39, 2 }
 0x60f   :  { %v657_v48 = vld [vmem:[#allocation3 + $0x28] sm:$0x1]  ;;  %v681_v52 = vrot.slane %v656_v50, 1  ;;  %v677_v56 = vsel %vm674_vm2, %v675_v46, %v676_v47  ;;  %v946_v11 = vld [vmem:[#allocation3 + $0x8] sm:$0xfc] }
 0x610   :  { %2079 = vmatprep.mubr.msk.bf16.mxu0 %vm780_vm1, %v633_v42  ;;  %v683_v51 = vrot.slane %v657_v48, 1  ;;  %v680_v54 = vsel %vm674_vm2, %v678_v44, %v679_v45  ;;  %v948_v60 = vld [vmem:[#allocation3 + $0x28] sm:$0x3]  ;;  %v658_v2 = vld [vmem:[#allocation3 + $0x30] sm:$0xfe]  ;;  %v965_v19 = vrot.slane %v946_v11, 2 }
 0x611   :  { %929 = vmatmul.mubr.bf16.vlgmr.msra.gmra.mxu0 %v632_v43  ;;  %v659_v53 = vld [vmem:[#allocation3 + $0x38] sm:$0xfe]  ;;  %v682_v57 = vsel %vm674_vm2, %v676_v47, %v681_v52  ;;  %v628_v8 = vld [vmem:[#allocation3 + $0x30] sm:$0xff]  ;;  %v970_v14 = vrot.slane %v948_v60, 2  ;;  %v685_v17 = vrot.slane %v658_v2, 1  ;;  %v963_v42 = vrot.slane %v2683_v40, 2 }
 0x612   :  { %v684_v55 = vsel %vm674_vm2, %v679_v45, %v683_v51  ;;  %v629_v58 = vld [vmem:[#allocation3 + $0x38] sm:$0xff]  ;;  %v703_v62 = vpack.c.bf16 %v682_v57, %v677_v56  ;;  %v2698_v1 = vld [vmem:[#allocation3 + $0x40] sm:$0xff]  ;;  %v688_v5 = vrot.slane %v659_v53, 1  ;;  %v967_v27 = vsel %vm961_vm3, %v965_v19, %v966_v21  ;;  %v949_v53 = vld [vmem:[#allocation3 + $0x30] sm:$0xfc] }
 0x613   :  { %v704_v61 = vpack.c.bf16 %v684_v55, %v680_v54  ;;  %v2696_v63 = vld [vmem:[#allocation3 + $0x48] sm:$0xff]  ;;  %v686_v10 = vrot.slane %v2698_v1, 1  ;;  %v634_v12 = vpack.c.bf16 %v2698_v1, %v628_v8  ;;  %v971_v24 = vsel %vm961_vm3, %v966_v21, %v970_v14  ;;  %v947_v33 = vld [vmem:[#allocation3 + $0x20] sm:$0x3]  ;;  %v945_v36 = vld [vmem:[#allocation3] sm:$0xfc] }
 0x614   :  { %v635_v3 = vpack.c.bf16 %v2696_v63, %v629_v58  ;;  %v689_v6 = vrot.slane %v2696_v63, 1  ;;  %v660_v7 = vld [vmem:[#allocation3 + $0x50] sm:$0x1]  ;;  %v991_v28 = vpack.c.bf16 %v971_v24, %v967_v27  ;;  %v968_v37 = vrot.slane %v947_v33, 2  ;;  %v950_v38 = vld [vmem:[#allocation3 + $0x38] sm:$0xfc] }
 0x615   :  { %v661_v4 = vld [vmem:[#allocation3 + $0x58] sm:$0x1]  ;;  %2068 = vmatprep.mubr.msk.bf16.mxu1 %vm780_vm1, %v704_v61  ;;  %v691_v0 = vrot.slane %v660_v7, 1  ;;  %v687_v22 = vsel %vm674_vm2, %v685_v17, %v686_v10  ;;  %v976_v39 = vrot.slane %v2696_v63, 2  ;;  %v2273_v43 = vld [vmem:[#allocation9 + $0xd0] sm:$0xff]   ;;  %v962_v44 = vrot.slane %v945_v36, 2 }
 0x616   :  { %v693_v9 = vrot.slane %v661_v4, 1  ;;  %820 = vmatmul.mubr.bf16.vlgmr.msra.gmra.mxu1 %v703_v62  ;;  %2080 = vmatprep.mubr.msk.bf16.mxu0 %vm780_vm1, %v635_v3  ;;  %v690_v13 = vsel %vm674_vm2, %v688_v5, %v689_v6  ;;  %v952_v35 = vld [vmem:[#allocation3 + $0x58] sm:$0x3]  ;;  %v975_v45 = vrot.slane %v950_v38, 2  ;;  %v969_v46 = vsel %vm961_vm3, %v963_v42, %v968_v37  ;;  %v951_v50 = vld [vmem:[#allocation3 + $0x50] sm:$0x3] }
 0x617   :  { %1074 = vmatpush1.bf16.msra.mxu1 %v2265_v59  ;;  %v692_v23 = vsel %vm674_vm2, %v686_v10, %v691_v0  ;;  %v980_v41 = vrot.slane %v952_v35, 2  ;;  %v964_v51 = vsel %vm961_vm3, %v962_v44, %v963_v42  ;;  %v973_v54 = vrot.slane %v2698_v1, 2 }
 0x618   :  { %v694_v15 = vsel %vm674_vm2, %v689_v6, %v693_v9  ;;  %1075 = vmatprep.subr.bf16.mxu1 %v2453_v49  ;;  %v705_v26 = vpack.c.bf16 %v692_v23, %v687_v22  ;;  %v977_v47 = vsel %vm961_vm3, %v975_v45, %v976_v39  ;;  %v990_v52 = vpack.c.bf16 %v969_v46, %v964_v51 }
 0x619   :  { %937 = vmatmul.mubr.bf16.gmra.mxu0 %v634_v12  ;;  %v706_v18 = vpack.c.bf16 %v694_v15, %v690_v13  ;;  %v981_v48 = vsel %vm961_vm3, %v976_v39, %v980_v41  ;;  %v978_v55 = vrot.slane %v951_v50, 2  ;;  %v972_v56 = vrot.slane %v949_v53, 2 }
 0x61a   :  { %v993_v40 = vpack.c.bf16 %v981_v48, %v977_v47 }
 0x61b   :  { %2069 = vmatprep.mubr.msk.bf16.mxu1 %vm780_vm1, %v706_v18  ;;  %1076 = vmatpush1.bf16.msra.mxu1 %v2266_v16  ;;  %v974_v57 = vsel %vm961_vm3, %v972_v56, %v973_v54  ;;  %v979_v58 = vsel %vm961_vm3, %v973_v54, %v978_v55 }
 0x61c   :  { %1077 = vmatprep.subr.bf16.mxu1 %v2453_v49  ;;  %v992_v59 = vpack.c.bf16 %v979_v58, %v974_v57 }
 0x61e   :  { %828 = vmatmul.mubr.bf16.gmra.mxu1 %v705_v26 }
 0x61f   :  { %1078 = vmatpush1.bf16.msra.mxu1 %v2267_v25  ;;  %2090 = vmatprep.mubr.msk.bf16.mxu1 %vm780_vm1, %v991_v28 }
 0x620   :  { %1079 = vmatprep.subr.bf16.mxu1 %v2453_v49 }
 0x623   :  { %1080 = vmatpush1.bf16.msra.mxu1 %v2268_v29 }
 0x624   :  { %1081 = vmatprep.subr.bf16.mxu1 %v2453_v49 }
 0x627   :  { %1082 = vmatpush1.bf16.msra.mxu1 %v2269_v30 }
 0x628   :  { %1083 = vmatprep.subr.bf16.mxu1 %v2453_v49 }
 0x62b   :  { %1084 = vmatpush1.bf16.msra.mxu1 %v2270_v31 }
 0x62c   :  { %1085 = vmatprep.subr.bf16.mxu1 %v2453_v49 }
 0x62f   :  { %1086 = vmatpush1.bf16.msra.mxu1 %v2271_v32 }
 0x630   :  { %1087 = vmatprep.subr.bf16.mxu1 %v2453_v49 }
 0x633   :  { %1088 = vmatpush1.bf16.msra.mxu1 %v2272_v34 }
 0x634   :  { %1103 = vmatprep.subr.bf16.mxu1 %v2453_v49 }
 0x637   :  { %1104 = vmatpush2.bf16.msra.mxu1 %v2273_v43 }
 0x638   :  { %1521 = vmatprep.subr.bf16.mxu1 %v2453_v49 }
 0x63a   :  { %1106 = vmatmul.mubr.bf16.vlgmr.msra.gmra.mxu1 %v990_v52 }
 0x63b   :  { %2091 = vmatprep.mubr.msk.bf16.mxu1 %vm780_vm1, %v993_v40 }
 0x642   :  { %1114 = vmatmul.mubr.bf16.gmra.mxu1 %v992_v59 }
 0x6d1   :  { %v930_v60 = vpop.f32.mrf.mxu0 }
 0x6d3   :  { %v932_v61 = vpop.f32.mrf.mxu0 }
 0x6d5   :  { %v933_v62 = vpop.f32.mrf.mxu0 }
 0x6d6   :  { %v821_v63 = vpop.f32.mrf.mxu1 }
 0x6d7   :  { %v935_v2 = vpop.f32.mrf.mxu0  ;;  %v931_v17 = vadd.f32 %v930_v60, %v821_v63 }
 0x6d8   :  { %v823_v3 = vpop.f32.mrf.mxu1 }
 0x6d9   :  { %v938_v4 = vpop.f32.mrf.mxu0 }
 0x6da   :  { %v824_v5 = vpop.f32.mrf.mxu1 }
 0x6db   :  { %v940_v1 = vpop.f32.mrf.mxu0  ;;  %v934_v15 = vadd.f32 %v933_v62, %v824_v5 }
 0x6dc   :  { %v826_v6 = vpop.f32.mrf.mxu1 }
 0x6dd   :  { %v941_v7 = vpop.f32.mrf.mxu0 }
 0x6de   :  { %v829_v8 = vpop.f32.mrf.mxu1 }
 0x6df   :  { %v943_v9 = vpop.f32.mrf.mxu0  ;;  %v939_v18 = vadd.f32 %v938_v4, %v829_v8 }
 0x6e0   :  { %v831_v10 = vpop.f32.mrf.mxu1  ;;  %v2274_v9 = vld [vmem:[#allocation10 + $0x38] sm:$0xff]  }
 0x6e1   :  { %v2276_v10 = vld [vmem:[#allocation10 + $0x80] sm:$0xff]   ;;  %1522 = vmatpush1.bf16.msra.mxu1 %v2274_v9  ;;  %v2293_v9 = vld [vmem:[#allocation12 + $0x10] sm:$0xff]  }
 0x6e2   :  { %v832_v0 = vpop.f32.mrf.mxu1  ;;  %1413 = vmatpush1.bf16.msra.mxu0 %v2276_v10  ;;  %1523 = vmatprep.subr.bf16.mxu1 %v2453_v49 }
 0x6e3   :  { %v942_v25 = vadd.f32 %v941_v7, %v832_v0  ;;  %v2275_v0 = vld [vmem:[#allocation10 + $0x30] sm:$0xff]   ;;  %1414 = vmatprep.subr.bf16.mxu0 %v2453_v49 }
 0x6e4   :  { %v834_v11 = vpop.f32.mrf.mxu1 }
 0x6e5   :  { %v2278_v11 = vld [vmem:[#allocation10 + $0x78] sm:$0xff]   ;;  %1524 = vmatpush1.bf16.msra.mxu1 %v2275_v0 }
 0x6e6   :  { %1415 = vmatpush1.bf16.msra.mxu0 %v2278_v11  ;;  %1525 = vmatprep.subr.bf16.mxu1 %v2453_v49 }
 0x6e7   :  { %1416 = vmatprep.subr.bf16.mxu0 %v2453_v49 }
 0x6fa   :  { %v1107_v12 = vpop.f32.mrf.mxu1 }
 0x6fb   :  { %v1122_v22 = vadd.f32 %v1107_v12, %v931_v17  ;;  %v2277_v12 = vld [vmem:[#allocation10 + $0x28] sm:$0xff]   ;;  %v2284_v17 = vld [vmem:[#allocation10 + $0x60] sm:$0xff]  }
 0x6fc   :  { %v1109_v13 = vpop.f32.mrf.mxu1  ;;  %1526 = vmatpush1.bf16.msra.mxu1 %v2277_v12 }
 0x6fd   :  { %v2280_v13 = vld [vmem:[#allocation10 + $0x70] sm:$0xff]   ;;  %1527 = vmatprep.subr.bf16.mxu1 %v2453_v49 }
 0x6fe   :  { %v1110_v14 = vpop.f32.mrf.mxu1  ;;  %1417 = vmatpush1.bf16.msra.mxu0 %v2280_v13 }
 0x6ff   :  { %v1123_v19 = vadd.f32 %v1110_v14, %v934_v15  ;;  %v2279_v14 = vld [vmem:[#allocation10 + $0x20] sm:$0xff]   ;;  %v2282_v15 = vld [vmem:[#allocation10 + $0x68] sm:$0xff]   ;;  %1418 = vmatprep.subr.bf16.mxu0 %v2453_v49 }
 0x700   :  { %v1112_v16 = vpop.f32.mrf.mxu1  ;;  %1528 = vmatpush1.bf16.msra.mxu1 %v2279_v14 }
 0x701   :  { %v1126_v26 = vadd.f32 %v1123_v19, %v1122_v22  ;;  %v2281_v16 = vld [vmem:[#allocation10 + $0x18] sm:$0xff]   ;;  %1529 = vmatprep.subr.bf16.mxu1 %v2453_v49 }
 0x702   :  { %v1115_v21 = vpop.f32.mrf.mxu1  ;;  %1419 = vmatpush1.bf16.msra.mxu0 %v2282_v15  ;;  %v2294_v15 = vld [vmem:[#allocation10 + $0xc8] sm:$0xff]  }
 0x703   :  { %v1124_v23 = vadd.f32 %v1115_v21, %v939_v18  ;;  %1420 = vmatprep.subr.bf16.mxu0 %v2453_v49  ;;  %v2283_v18 = vld [vmem:[#allocation10 + $0x10] sm:$0xff]  }
 0x704   :  { %v1117_v24 = vpop.f32.mrf.mxu1  ;;  %1530 = vmatpush1.bf16.msra.mxu1 %v2281_v16  ;;  %v2295_v16 = vld [vmem:[#allocation12 + $0x8] sm:$0xff]  }
 0x705   :  { %v1127_v28 = vadd.f32 %v1126_v26, %v1124_v23  ;;  %1531 = vmatprep.subr.bf16.mxu1 %v2453_v49  ;;  %v1182_v24 = vld [vmem:[%s2934_s5] sm:$0x1] }
 0x706   :  { %v1118_v27 = vpop.f32.mrf.mxu1  ;;  %1421 = vmatpush1.bf16.msra.mxu0 %v2284_v17 }
 0x707   :  { %v1125_v29 = vadd.f32 %v1118_v27, %v942_v25  ;;  %1422 = vmatprep.subr.bf16.mxu0 %v2453_v49  ;;  %v2285_v27 = vld [vmem:[#allocation10 + $0x8] sm:$0xff]  }
 0x708   :  { %v1120_v30 = vpop.f32.mrf.mxu1  ;;  %1532 = vmatpush1.bf16.msra.mxu1 %v2283_v18  ;;  %v1831_v18 = vld [vmem:[#allocation4] sm:$0xff] }
 0x709   :  { %v1128_v31 = vadd.f32 %v1127_v28, %v1125_v29  ;;  %1533 = vmatprep.subr.bf16.mxu1 %v2453_v49  ;;  %v2286_v28 = vld [vmem:[#allocation10 + $0x58] sm:$0xff]   ;;  %v2092_v30 = vld [vmem:[%s2935_s6] ss:$0 sm:$0xff] }
 0x70a   :  { %1423 = vmatpush1.bf16.msra.mxu0 %v2286_v28 }
 0x70b   :  { %v1129_v32 = vrot.slane %v1128_v31, 4  ;;  %1424 = vmatprep.subr.bf16.mxu0 %v2453_v49 }
 0x70c   :  { %1534 = vmatpush1.bf16.msra.mxu1 %v2285_v27 }
 0x70d   :  { %v1130_v33 = vadd.f32 %v1129_v32, %v1128_v31  ;;  %1535 = vmatprep.subr.bf16.mxu1 %v2453_v49 }
 0x70f   :  { %v1131_v34 = vrot.slane %v1130_v33, 2 }
 0x711   :  { %v1132_v35 = vadd.f32 %v1131_v34, %v1130_v33 }
 0x713   :  { %v1133_v36 = vrot.slane %v1132_v35, 1 }
 0x715   :  { %v1134_v37 = vadd.f32 %v1133_v36, %v1132_v35  ;;  %v2287_v35 = vld [vmem:[#allocation10] sm:$0xff]   ;;  %v2288_v36 = vld [vmem:[#allocation10 + $0x50] sm:$0xff]  }
 0x716   :  { %1536 = vmatpush1.bf16.msra.mxu1 %v2287_v35  ;;  %1425 = vmatpush1.bf16.msra.mxu0 %v2288_v36 }
 0x717   :  { %1135 = vrot.lane.b32.xlu0 %v1134_v37, %s2447_s23  ;;  %1551 = vmatprep.subr.bf16.mxu1 %v2453_v49 }
 0x718   :  { %1426 = vmatprep.subr.bf16.mxu0 %v2453_v49 }
 0x789   :  { %v1136_v38 = vpop.permute.xlu0 %1135 }
 0x78a   :  { %v1137_v39 = vadd.f32 %v1136_v38, %v1134_v37 }
 0x78c   :  { %1138 = vrot.lane.b32.xlu1 %v1137_v39, %s2451_s4 }
 0x7fe   :  { %v1139_v41 = vpop.permute.xlu1 %1138 }
 0x7ff   :  { %v1140_v42 = vadd.f32 %v1139_v41, %v1137_v39 }
 0x801   :  { %1141 = vrot.lane.b32.xlu0 %v1140_v42, %s2452_s10 }
 0x873   :  { %v1142_v43 = vpop.permute.xlu0 %1141 }
 0x874   :  { %v1143_v44 = vadd.f32 %v1142_v43, %v1140_v42 }
 0x876   :  { %1144 = vrot.lane.b32.xlu1 %v1143_v44, %s2442_s28 }
 0x8e8   :  { %v1145_v45 = vpop.permute.xlu1 %1144 }
 0x8e9   :  { %v1146_v46 = vadd.f32 %v1145_v45, %v1143_v44  ;;  %v2289_v44 = vld [vmem:[#allocation10 + $0x40] sm:$0xff]   ;;  %v2290_v45 = vld [vmem:[#allocation10 + $0x48] sm:$0xff]  }
 0x8ea   :  { %1552 = vmatpush2.bf16.msra.mxu1 %v2289_v44  ;;  %1427 = vmatpush1.bf16.msra.mxu0 %v2290_v45 }
 0x8eb   :  { %v1147_v47 = vmul.f32 0.001953125, %v1146_v46  ;;  %1442 = vmatprep.subr.bf16.mxu0 %v2453_v49 }
 0x8ed   :  { %v1151_v48 = vrot.slane %v1147_v47, %v2591_v20 }
 0x8ef   :  { %v2739_v50 = vsub.f32 %v1122_v22, %v1151_v48  ;;  %v2741_v51 = vsub.f32 %v1123_v19, %v1151_v48  ;;  %v2743_v52 = vsub.f32 %v1124_v23, %v1151_v48  ;;  %v2745_v53 = vsub.f32 %v1125_v29, %v1151_v48 }
 0x8f1   :  { %v1156_v40 = vmul.f32 %v2739_v50, %v2739_v50  ;;  %v1157_v54 = vmul.f32 %v2741_v51, %v2741_v51  ;;  %v1158_v55 = vmul.f32 %v2743_v52, %v2743_v52  ;;  %v1159_v57 = vmul.f32 %v2745_v53, %v2745_v53 }
 0x8f3   :  { %v1160_v56 = vadd.f32 %v1157_v54, %v1156_v40 }
 0x8f5   :  { %v1161_v58 = vadd.f32 %v1160_v56, %v1158_v55 }
 0x8f7   :  { %v1162_v59 = vadd.f32 %v1161_v58, %v1159_v57 }
 0x8f9   :  { %v1163_v60 = vrot.slane %v1162_v59, 4 }
 0x8fb   :  { %v1164_v61 = vadd.f32 %v1163_v60, %v1162_v59 }
 0x8fd   :  { %v1165_v62 = vrot.slane %v1164_v61, 2 }
 0x8ff   :  { %v1166_v63 = vadd.f32 %v1165_v62, %v1164_v61 }
 0x901   :  { %v1167_v2 = vrot.slane %v1166_v63, 1 }
 0x903   :  { %v1168_v3 = vadd.f32 %v1167_v2, %v1166_v63 }
 0x905   :  { %1169 = vrot.lane.b32.xlu0 %v1168_v3, %s2447_s23 }
 0x977   :  { %v1170_v4 = vpop.permute.xlu0 %1169 }
 0x978   :  { %v1171_v5 = vadd.f32 %v1170_v4, %v1168_v3 }
 0x97a   :  { %1172 = vrot.lane.b32.xlu1 %v1171_v5, %s2451_s4 }
 0x9ec   :  { %v1173_v1 = vpop.permute.xlu1 %1172 }
 0x9ed   :  { %v1174_v6 = vadd.f32 %v1173_v1, %v1171_v5 }
 0x9ef   :  { %1175 = vrot.lane.b32.xlu0 %v1174_v6, %s2452_s10 }
 0xa61   :  { %v1176_v7 = vpop.permute.xlu0 %1175 }
 0xa62   :  { %v1177_v8 = vadd.f32 %v1176_v7, %v1174_v6 }
 0xa64   :  { %1178 = vrot.lane.b32.xlu1 %v1177_v8, %s2442_s28 }
 0xad6   :  { %v1179_v19 = vpop.permute.xlu1 %1178 }
 0xad7   :  { %v1180_v21 = vadd.f32 %v1179_v19, %v1177_v8 }
 0xad9   :  { %v1181_v22 = vmul.f32 0.001953125, %v1180_v21 }
 0xadb   :  { %v1183_v23 = vadd.f32 1e-05, %v1181_v22 }
 0xadd   :  { %2307 = vrsqrt.f32 %v1183_v23 }
 0xaea   :  { %v2308_v25 = vpop.eup %2307 }
 0xaeb   :  { %v1185_v26 = vmul.f32 %v2308_v25, %v1182_v24 }
 0xaed   :  { %v1190_v29 = vrot.slane %v1185_v26, %v2591_v20  ;;  %v1832_v26 = vld [vmem:[#allocation4 + $0x8] sm:$0xff] }
 0xaef   :  { %v1192_v31 = vmul.f32 %v1190_v29, %v2739_v50  ;;  %v1193_v32 = vmul.f32 %v1190_v29, %v2741_v51  ;;  %v1194_v33 = vmul.f32 %v1190_v29, %v2743_v52  ;;  %v1195_v34 = vmul.f32 %v1190_v29, %v2745_v53  ;;  %v2291_v51 = vld [vmem:[#allocation12 + $0x18] sm:$0xff]   ;;  %v2292_v53 = vld [vmem:[#allocation10 + $0x88] sm:$0xff]  }
 0xaf0   :  { %2203 = vmatprep.subr.bf16.mxu1 %v2291_v51  ;;  %1443 = vmatpush2.bf16.msra.mxu0 %v2292_v53 }
 0xaf1   :  { %v1203_v37 = vadd.f32 %v2092_v30, %v1192_v31  ;;  %v1204_v38 = vadd.f32 %v2092_v30, %v1193_v32  ;;  %v1205_v39 = vadd.f32 %v2092_v30, %v1194_v33  ;;  %v1206_v41 = vadd.f32 %v2092_v30, %v1195_v34  ;;  %1697 = vmatprep.subr.bf16.mxu0 %v2453_v49 }
 0xaf3   :  { %v1207_v42 = vmax.f32 %v1203_v37, 0.0  ;;  %v1208_v43 = vmax.f32 %v1204_v38, 0.0  ;;  %v1209_v48 = vmax.f32 %v1205_v39, 0.0  ;;  %v1210_v50 = vmax.f32 %v1206_v41, 0.0 }
 0xaf5   :  { %v1215_v46 = vrot.slane %v1207_v42, 7  ;;  %v1216_v47 = vrot.slane %v1208_v43, 7  ;;  %v1218_v40 = vrot.slane %v1209_v48, 7  ;;  %v1219_v54 = vrot.slane %v1210_v50, 7  ;;  %v2296_v50 = vld [vmem:[#allocation10 + $0xc0] sm:$0xff]  }
 0xaf6   :  { %v1835_v43 = vpack.c.bf16 %v1832_v26, %v1831_v18 }
 0xaf7   :  { %1221 = vrot.lane.b32.xlu0 %v1215_v46, %s2447_s23  ;;  %v1217_v52 = vsel %vm584_vm13, %v1215_v46, %v1216_v47  ;;  %v1220_v55 = vsel %vm584_vm13, %v1218_v40, %v1219_v54  ;;  %v2297_v46 = vld [vmem:[#allocation12] sm:$0xff]  }
 0xaf8   :  { %1223 = vrot.lane.b32.xlu1 %v1217_v52, %s2447_s23 }
 0xafb   :  { %1225 = vrot.lane.b32.xlu0 %v1216_v47, %s2447_s23 }
 0xafc   :  { %1227 = vrot.lane.b32.xlu1 %v1218_v40, %s2447_s23 }
 0xaff   :  { %1229 = vrot.lane.b32.xlu0 %v1220_v55, %s2447_s23 }
 0xb00   :  { %1231 = vrot.lane.b32.xlu1 %v1219_v54, %s2447_s23 }
 0xb69   :  { %v1222_v56 = vpop.permute.xlu0 %1221 }
 0xb6a   :  { %1239 = vst.msk [vmem:[#allocation3] sm:$0xfe] %vm609_vm14, %v1222_v56  ;;  %v1224_v57 = vpop.permute.xlu1 %1223 }
 0xb6b   :  { %1240 = vst.msk [vmem:[#allocation3 + $0x8] sm:$0xfe] %vm144_vm7, %v1222_v56  ;;  %v1833_v56 = vld [vmem:[#allocation4 + $0x10] sm:$0xff] }
 0xb6c   :  { %1241 = vst.msk [vmem:[#allocation3 + $0x10] sm:$0xff] %vm612_vm15, %v1224_v57 }
 0xb6d   :  { %1242 = vst.msk [vmem:[#allocation3 + $0x18] sm:$0xff] %vm146_vm9, %v1224_v57  ;;  %v1226_v58 = vpop.permute.xlu0 %1225  ;;  %v1834_v57 = vld [vmem:[#allocation4 + $0x18] sm:$0xff] }
 0xb6e   :  { %1243 = vst.msk [vmem:[#allocation3 + $0x20] sm:$0x1] %vm615_vm0, %v1226_v58  ;;  %v1228_v59 = vpop.permute.xlu1 %1227 }
 0xb6f   :  { %1244 = vst.msk [vmem:[#allocation3 + $0x28] sm:$0x1] %vm148_vm11, %v1226_v58 }
 0xb70   :  { %1245 = vst.msk [vmem:[#allocation3 + $0x30] sm:$0xfe] %vm609_vm14, %v1228_v59 }
 0xb71   :  { %1246 = vst.msk [vmem:[#allocation3 + $0x38] sm:$0xfe] %vm144_vm7, %v1228_v59  ;;  %v1230_v60 = vpop.permute.xlu0 %1229  ;;  %v1251_v62 = vld [vmem:[#allocation3] sm:$0xff] }
 0xb72   :  { %v1252_v61 = vld [vmem:[#allocation3 + $0x8] sm:$0xff]  ;;  %1247 = vst.msk [vmem:[#allocation3 + $0x40] sm:$0xff] %vm612_vm15, %v1230_v60  ;;  %v1232_v2 = vpop.permute.xlu1 %1231  ;;  %v1281_v5 = vld [vmem:[#allocation3] sm:$0xfe] }
 0xb73   :  { %v1282_v63 = vld [vmem:[#allocation3 + $0x8] sm:$0xfe]  ;;  %1248 = vst.msk [vmem:[#allocation3 + $0x48] sm:$0xff] %vm146_vm9, %v1230_v60  ;;  %v2807_v4 = vld [vmem:[#allocation3 + $0x10] sm:$0xff]  ;;  %v1301_v0 = vrot.slane %v1281_v5, 1  ;;  %v2298_v59 = vld [vmem:[#allocation10 + $0xb8] sm:$0xff]  }
 0xb74   :  { %v2805_v3 = vld [vmem:[#allocation3 + $0x18] sm:$0xff]  ;;  %1249 = vst.msk [vmem:[#allocation3 + $0x50] sm:$0x1] %vm615_vm0, %v1232_v2  ;;  %v1259_v6 = vpack.c.bf16 %v2807_v4, %v1251_v62  ;;  %v1302_v8 = vrot.slane %v2807_v4, 1  ;;  %v1304_v10 = vrot.slane %v1282_v63, 1  ;;  %v1836_v62 = vpack.c.bf16 %v1834_v57, %v1833_v56  ;;  %v2301_v5 = vld [vmem:[#allocation10 + $0xa0] sm:$0xff]  }
 0xb75   :  { %1250 = vst.msk [vmem:[#allocation3 + $0x58] sm:$0x1] %vm148_vm11, %v1232_v2  ;;  %v1260_v1 = vpack.c.bf16 %v2805_v3, %v1252_v61  ;;  %v1305_v7 = vrot.slane %v2805_v3, 1  ;;  %v1283_v12 = vld [vmem:[#allocation3 + $0x20] sm:$0x1]  ;;  %v1590_v52 = vrot.slane %v2805_v3, 2 }
 0xb76   :  { %v1284_v11 = vld [vmem:[#allocation3 + $0x28] sm:$0x1]  ;;  %v1307_v14 = vrot.slane %v1283_v12, 1  ;;  %v1303_v22 = vsel %vm674_vm2, %v1301_v0, %v1302_v8  ;;  %v1571_v42 = vld [vmem:[#allocation3 + $0x8] sm:$0xfc]  ;;  %v2299_v2 = vld [vmem:[#allocation10 + $0xb0] sm:$0xff]  }
 0xb77   :  { %2113 = vmatprep.mubr.msk.bf16.mxu1 %vm780_vm1, %v1260_v1  ;;  %v1309_v13 = vrot.slane %v1284_v11, 1  ;;  %v1306_v19 = vsel %vm674_vm2, %v1304_v10, %v1305_v7  ;;  %v1573_v25 = vld [vmem:[#allocation3 + $0x28] sm:$0x3]  ;;  %v1285_v31 = vld [vmem:[#allocation3 + $0x30] sm:$0xfe]  ;;  %v1589_v40 = vrot.slane %v1571_v42, 2 }
 0xb78   :  { %1554 = vmatmul.mubr.bf16.vlgmr.msra.gmra.mxu1 %v1259_v6  ;;  %v1286_v17 = vld [vmem:[#allocation3 + $0x38] sm:$0xfe]  ;;  %v1308_v23 = vsel %vm674_vm2, %v1302_v8, %v1307_v14  ;;  %v1255_v37 = vld [vmem:[#allocation3 + $0x30] sm:$0xff]  ;;  %v1594_v47 = vrot.slane %v1573_v25, 2  ;;  %v1572_v6 = vld [vmem:[#allocation3 + $0x20] sm:$0x3] }
 0xb79   :  { %2204 = vmatpush3.bf16.msra.mxu1 %v2291_v51  ;;  %v1310_v21 = vsel %vm674_vm2, %v1305_v7, %v1309_v13  ;;  %v1256_v24 = vld [vmem:[#allocation3 + $0x38] sm:$0xff]  ;;  %v1329_v28 = vpack.c.bf16 %v1308_v23, %v1303_v22  ;;  %v2822_v30 = vld [vmem:[#allocation3 + $0x40] sm:$0xff]  ;;  %v1314_v35 = vrot.slane %v1286_v17, 1  ;;  %v1311_v51 = vrot.slane %v1285_v31, 1  ;;  %v2300_v3 = vld [vmem:[#allocation10 + $0xa8] sm:$0xff]  }
 0xb7a   :  { %2205 = vmatprep.subr.bf16.mxu1 %v2293_v9  ;;  %v1330_v27 = vpack.c.bf16 %v1310_v21, %v1306_v19  ;;  %v2820_v29 = vld [vmem:[#allocation3 + $0x48] sm:$0xff]  ;;  %v1312_v38 = vrot.slane %v2822_v30, 1  ;;  %v1261_v44 = vpack.c.bf16 %v2822_v30, %v1255_v37  ;;  %v1595_v58 = vsel %vm961_vm3, %v1590_v52, %v1594_v47  ;;  %v2302_v1 = vld [vmem:[#allocation10 + $0x98] sm:$0xff]   ;;  %v2303_v7 = vld [vmem:[#allocation10 + $0x90] sm:$0xff]  }
 0xb7b   :  { %v1262_v32 = vpack.c.bf16 %v2820_v29, %v1256_v24  ;;  %v1315_v33 = vrot.slane %v2820_v29, 1  ;;  %v1287_v36 = vld [vmem:[#allocation3 + $0x50] sm:$0x1]  ;;  %v1591_v61 = vsel %vm961_vm3, %v1589_v40, %v1590_v52  ;;  %v1592_v10 = vrot.slane %v1572_v6, 2  ;;  %v1575_v0 = vld [vmem:[#allocation3 + $0x38] sm:$0xfc] }
 0xb7c   :  { %v1288_v34 = vld [vmem:[#allocation3 + $0x58] sm:$0x1]  ;;  %2102 = vmatprep.mubr.msk.bf16.mxu0 %vm780_vm1, %v1330_v27  ;;  %v1317_v41 = vrot.slane %v1287_v36, 1  ;;  %v1313_v54 = vsel %vm674_vm2, %v1311_v51, %v1312_v38  ;;  %v1615_v63 = vpack.c.bf16 %v1595_v58, %v1591_v61  ;;  %v1600_v11 = vrot.slane %v2820_v29, 2  ;;  %v1576_v21 = vld [vmem:[#allocation3 + $0x50] sm:$0x3] }
 0xb7d   :  { %2206 = vmatpush3.bf16.msra.mxu1 %v2293_v9  ;;  %v1319_v39 = vrot.slane %v1288_v34, 1  ;;  %1445 = vmatmul.mubr.bf16.vlgmr.msra.gmra.mxu0 %v1329_v28  ;;  %v1316_v45 = vsel %vm674_vm2, %v1314_v35, %v1315_v33  ;;  %v1577_v8 = vld [vmem:[#allocation3 + $0x58] sm:$0x3]  ;;  %v1570_v9 = vld [vmem:[#allocation3] sm:$0xfc]  ;;  %v1587_v13 = vrot.slane %v2807_v4, 2 }
 0xb7e   :  { %2114 = vmatprep.mubr.msk.bf16.mxu1 %vm780_vm1, %v1262_v32  ;;  %1698 = vmatpush1.bf16.msra.mxu0 %v2294_v15  ;;  %v1318_v55 = vsel %vm674_vm2, %v1312_v38, %v1317_v41  ;;  %v1604_v12 = vrot.slane %v1577_v8, 2  ;;  %v2304_v14 = vld [vmem:[#allocation10 + $0xd0] sm:$0xff]   ;;  %v1586_v15 = vrot.slane %v1570_v9, 2  ;;  %v1597_v4 = vrot.slane %v2822_v30, 2 }
 0xb7f   :  { %2207 = vmatprep.subr.bf16.mxu1 %v2295_v16  ;;  %v1320_v48 = vsel %vm674_vm2, %v1315_v33, %v1319_v39  ;;  %1699 = vmatprep.subr.bf16.mxu0 %v2453_v49  ;;  %v1331_v60 = vpack.c.bf16 %v1318_v55, %v1313_v54  ;;  %v1593_v17 = vsel %vm961_vm3, %v1587_v13, %v1592_v10  ;;  %v1574_v24 = vld [vmem:[#allocation3 + $0x30] sm:$0xfc]  ;;  %v1602_v26 = vrot.slane %v1576_v21, 2 }
 0xb80   :  { %1562 = vmatmul.mubr.bf16.gmra.mxu1 %v1261_v44  ;;  %v1332_v53 = vpack.c.bf16 %v1320_v48, %v1316_v45  ;;  %v1605_v19 = vsel %vm961_vm3, %v1600_v11, %v1604_v12  ;;  %v1588_v22 = vsel %vm961_vm3, %v1586_v15, %v1587_v13 }
 0xb81   :  { %2208 = vmatpush3.bf16.msra.mxu1 %v2295_v16  ;;  %2211 = vmatprep.mubr.msk.bf16.mxu1 %vm1869_vm4, %v1835_v43  ;;  %v1599_v16 = vrot.slane %v1575_v0, 2  ;;  %v1614_v23 = vpack.c.bf16 %v1593_v17, %v1588_v22  ;;  %v1603_v28 = vsel %vm961_vm3, %v1597_v4, %v1602_v26 }
 0xb82   :  { %2103 = vmatprep.mubr.msk.bf16.mxu0 %vm780_vm1, %v1332_v53  ;;  %2209 = vmatprep.subr.bf16.mxu1 %v2297_v46 }
 0xb83   :  { %1700 = vmatpush1.bf16.msra.mxu0 %v2296_v50  ;;  %v1601_v18 = vsel %vm961_vm3, %v1599_v16, %v1600_v11 }
 0xb84   :  { %1701 = vmatprep.subr.bf16.mxu0 %v2453_v49  ;;  %v1617_v25 = vpack.c.bf16 %v1605_v19, %v1601_v18 }
 0xb85   :  { %2210 = vmatpush3.bf16.msra.mxu1 %v2297_v46  ;;  %1453 = vmatmul.mubr.bf16.gmra.mxu0 %v1331_v60 }
 0xb86   :  { %2124 = vmatprep.mubr.msk.bf16.mxu0 %vm780_vm1, %v1615_v63 }
 0xb87   :  { %1702 = vmatpush1.bf16.msra.mxu0 %v2298_v59 }
 0xb88   :  { %2212 = vmatmul.mubr.msk.bf16.vlgmr.msra.gmra.mxu1 %vm1869_vm4, %v1836_v62  ;;  %1703 = vmatprep.subr.bf16.mxu0 %v2453_v49 }
 0xb8b   :  { %1704 = vmatpush1.bf16.msra.mxu0 %v2299_v2 }
 0xb8c   :  { %1705 = vmatprep.subr.bf16.mxu0 %v2453_v49 }
 0xb8f   :  { %1706 = vmatpush1.bf16.msra.mxu0 %v2300_v3 }
 0xb90   :  { %1707 = vmatprep.subr.bf16.mxu0 %v2453_v49 }
 0xb93   :  { %1708 = vmatpush1.bf16.msra.mxu0 %v2301_v5 }
 0xb94   :  { %1709 = vmatprep.subr.bf16.mxu0 %v2453_v49 }
 0xb97   :  { %1710 = vmatpush1.bf16.msra.mxu0 %v2302_v1 }
 0xb98   :  { %1711 = vmatprep.subr.bf16.mxu0 %v2453_v49 }
 0xb9b   :  { %1712 = vmatpush1.bf16.msra.mxu0 %v2303_v7 }
 0xb9c   :  { %1727 = vmatprep.subr.bf16.mxu0 %v2453_v49  ;;  %v1596_v49 = vrot.slane %v1574_v24, 2 }
 0xb9e   :  { %v1598_v27 = vsel %vm961_vm3, %v1596_v49, %v1597_v4 }
 0xb9f   :  { %1728 = vmatpush2.bf16.msra.mxu0 %v2304_v14  ;;  %v1616_v29 = vpack.c.bf16 %v1603_v28, %v1598_v27 }
 0xba2   :  { %1730 = vmatmul.mubr.bf16.vlgmr.msra.gmra.mxu0 %v1614_v23 }
 0xba3   :  { %2125 = vmatprep.mubr.msk.bf16.mxu0 %vm780_vm1, %v1617_v25 }
 0xbaa   :  { %1738 = vmatmul.mubr.bf16.gmra.mxu0 %v1616_v29 }
 0xc38   :  { %v1555_v31 = vpop.f32.mrf.mxu1 }
 0xc3a   :  { %v1557_v32 = vpop.f32.mrf.mxu1 }
 0xc3c   :  { %v1558_v33 = vpop.f32.mrf.mxu1 }
 0xc3d   :  { %v1446_v34 = vpop.f32.mrf.mxu0 }
 0xc3e   :  { %v1560_v35 = vpop.f32.mrf.mxu1  ;;  %v1556_v3 = vadd.f32 %v1555_v31, %v1446_v34 }
 0xc3f   :  { %v1448_v36 = vpop.f32.mrf.mxu0 }
 0xc40   :  { %v1563_v37 = vpop.f32.mrf.mxu1 }
 0xc41   :  { %v1449_v30 = vpop.f32.mrf.mxu0 }
 0xc42   :  { %v1565_v38 = vpop.f32.mrf.mxu1  ;;  %v1559_v63 = vadd.f32 %v1558_v33, %v1449_v30 }
 0xc43   :  { %v1451_v39 = vpop.f32.mrf.mxu0 }
 0xc44   :  { %v1566_v41 = vpop.f32.mrf.mxu1 }
 0xc45   :  { %v1454_v42 = vpop.f32.mrf.mxu0 }
 0xc46   :  { %v1568_v43 = vpop.f32.mrf.mxu1  ;;  %v1564_v5 = vadd.f32 %v1563_v37, %v1454_v42 }
 0xc47   :  { %v1456_v44 = vpop.f32.mrf.mxu0 }
 0xc48   :  { %v2859_v45 = vpop.f32.mrf.mxu1 }
 0xc49   :  { %v1457_v46 = vpop.f32.mrf.mxu0 }
 0xc4a   :  { %v1910_v47 = vpop.f32.mrf.mxu1  ;;  %v1567_v10 = vadd.f32 %v1566_v41, %v1457_v46 }
 0xc4b   :  { %v1459_v48 = vpop.f32.mrf.mxu0 }
 0xc4c   :  { %v2861_v50 = vpop.f32.mrf.mxu1 }
 0xc4e   :  { %v1913_v51 = vpop.f32.mrf.mxu1 }
 0xc4f   :  { %v1925_v52 = vadd.f32 %v1913_v51, %v1910_v47 }
 0xc51   :  { %v1926_v53 = vadd.f32 %v2859_v45, %v1925_v52 }
 0xc53   :  { %v1927_v40 = vadd.f32 %v2861_v50, %v1926_v53 }
 0xc55   :  { %v1928_v54 = vrot.slane %v1927_v40, 4 }
 0xc57   :  { %v1929_v55 = vadd.f32 %v1928_v54, %v1927_v40 }
 0xc59   :  { %v1930_v56 = vrot.slane %v1929_v55, 2 }
 0xc5b   :  { %v1931_v57 = vadd.f32 %v1930_v56, %v1929_v55 }
 0xc5d   :  { %v1932_v58 = vrot.slane %v1931_v57, 1 }
 0xc5f   :  { %v1933_v59 = vadd.f32 %v1932_v58, %v1931_v57 }
 0xc61   :  { %1934 = vrot.lane.b32.xlu1 %v1933_v59, %s2447_s23 }
 0xc62   :  { %v1731_v60 = vpop.f32.mrf.mxu0 }
 0xc63   :  { %v1746_v7 = vadd.f32 %v1731_v60, %v1556_v3 }
 0xc64   :  { %v1733_v61 = vpop.f32.mrf.mxu0 }
 0xc66   :  { %v1734_v62 = vpop.f32.mrf.mxu0 }
 0xc67   :  { %v2866_v1 = vadd.f32 %v1734_v62, %v1559_v63 }
 0xc68   :  { %v1736_v2 = vpop.f32.mrf.mxu0 }
 0xc69   :  { %v1750_v0 = vadd.f32 %v2866_v1, %v1746_v7 }
 0xc6a   :  { %v1739_v6 = vpop.f32.mrf.mxu0 }
 0xc6b   :  { %v1748_v8 = vadd.f32 %v1739_v6, %v1564_v5 }
 0xc6c   :  { %v1741_v9 = vpop.f32.mrf.mxu0 }
 0xc6d   :  { %v1751_v12 = vadd.f32 %v1750_v0, %v1748_v8 }
 0xc6e   :  { %v1742_v11 = vpop.f32.mrf.mxu0 }
 0xc6f   :  { %v1749_v13 = vadd.f32 %v1742_v11, %v1567_v10 }
 0xc70   :  { %v1744_v14 = vpop.f32.mrf.mxu0 }
 0xc71   :  { %v1752_v15 = vadd.f32 %v1751_v12, %v1749_v13 }
 0xc73   :  { %v1753_v16 = vrot.slane %v1752_v15, 4 }
 0xc75   :  { %v1754_v17 = vadd.f32 %v1753_v16, %v1752_v15 }
 0xc77   :  { %v1755_v18 = vrot.slane %v1754_v17, 2 }
 0xc79   :  { %v1756_v19 = vadd.f32 %v1755_v18, %v1754_v17 }
 0xc7b   :  { %v1757_v21 = vrot.slane %v1756_v19, 1 }
 0xc7d   :  { %v1758_v22 = vadd.f32 %v1757_v21, %v1756_v19 }
 0xc7f   :  { %1759 = vrot.lane.b32.xlu0 %v1758_v22, %s2447_s23 }
 0xcd3   :  { %v1935_v23 = vpop.permute.xlu1 %1934 }
 0xcd4   :  { %v1936_v24 = vadd.f32 %v1935_v23, %v1933_v59 }
 0xcd6   :  { %1937 = vrot.lane.b32.xlu1 %v1936_v24, %s2451_s4 }
 0xcf1   :  { %v1760_v4 = vpop.permute.xlu0 %1759 }
 0xcf2   :  { %v1761_v25 = vadd.f32 %v1760_v4, %v1758_v22 }
 0xcf4   :  { %1762 = vrot.lane.b32.xlu0 %v1761_v25, %s2451_s4 }
 0xd48   :  { %v1938_v26 = vpop.permute.xlu1 %1937 }
 0xd49   :  { %v1939_v49 = vadd.f32 %v1938_v26, %v1936_v24 }
 0xd4b   :  { %1940 = vrot.lane.b32.xlu1 %v1939_v49, %s2452_s10 }
 0xd66   :  { %v1763_v27 = vpop.permute.xlu0 %1762 }
 0xd67   :  { %v1764_v28 = vadd.f32 %v1763_v27, %v1761_v25 }
 0xd69   :  { %1765 = vrot.lane.b32.xlu0 %v1764_v28, %s2452_s10 }
 0xdbd   :  { %v1941_v29 = vpop.permute.xlu1 %1940 }
 0xdbe   :  { %v1942_v31 = vadd.f32 %v1941_v29, %v1939_v49 }
 0xdc0   :  { %1943 = vrot.lane.b32.xlu1 %v1942_v31, %s2442_s28 }
 0xddb   :  { %v1766_v32 = vpop.permute.xlu0 %1765 }
 0xddc   :  { %v1767_v33 = vadd.f32 %v1766_v32, %v1764_v28 }
 0xdde   :  { %1768 = vrot.lane.b32.xlu0 %v1767_v33, %s2442_s28 }
 0xe32   :  { %v1944_v34 = vpop.permute.xlu1 %1943 }
 0xe33   :  { %v1945_v35 = vadd.f32 %v1944_v34, %v1942_v31  ;;  %v1981_v34 = vld [vmem:[%s2940_s11] sm:$0x1] }
 0xe35   :  { %v1946_v36 = vmul.f32 0.001953125, %v1945_v35 }
 0xe37   :  { %v1950_v37 = vrot.slane %v1946_v36, %v2591_v20 }
 0xe39   :  { %v2877_v30 = vsub.f32 %v1910_v47, %v1950_v37  ;;  %v2879_v38 = vsub.f32 %v1913_v51, %v1950_v37  ;;  %v2882_v39 = vsub.f32 %v2859_v45, %v1950_v37  ;;  %v2885_v41 = vsub.f32 %v2861_v50, %v1950_v37  ;;  %v1806_v37 = vld [vmem:[%s2937_s8] sm:$0x1]  ;;  %s2454_s8 = smov [#allocation13]  }
 0xe3a   :  { %s2023_s30 = sshll.u32 %s2454_s8, 4  ;;  %s2024_s30 = int_to_ptr.vmem [resolvable:$true] %s2023_s30 }
 0xe3b   :  { %v1955_v42 = vmul.f32 %v2877_v30, %v2877_v30  ;;  %v1956_v43 = vmul.f32 %v2879_v38, %v2879_v38  ;;  %v1957_v44 = vmul.f32 %v2882_v39, %v2882_v39  ;;  %v1958_v47 = vmul.f32 %v2885_v41, %v2885_v41  ;;  %p2418_p12 = scmp.lt.s32.totalorder %s2024_s30, %s2024_s30 }
 0xe3d   :  { %v1959_v46 = vadd.f32 %v1956_v43, %v1955_v42 }
 0xe3f   :  { %v1960_v48 = vadd.f32 %v1959_v46, %v1957_v44 }
 0xe41   :  { %v1961_v51 = vadd.f32 %v1960_v48, %v1958_v47 }
 0xe43   :  { %v1962_v45 = vrot.slane %v1961_v51, 4 }
 0xe45   :  { %v1963_v52 = vadd.f32 %v1962_v45, %v1961_v51  ;;  %v2133_v45 = vld [vmem:[%s2941_s12] ss:$0 sm:$0xff] }
 0xe47   :  { %v1964_v53 = vrot.slane %v1963_v52, 2 }
 0xe49   :  { %v1965_v50 = vadd.f32 %v1964_v53, %v1963_v52  ;;  %v2126_v52 = vld [vmem:[%s2938_s9] ss:$0 sm:$0xff]  ;;  %s2413_s9 = scalar_lea.vmem %s2024_s30, 512 }
 0xe4a   :  { %p2414_p11 = scmp.ne.s32.totalorder %s2024_s30, %s2413_s9  ;;  %p2419_p13 = scmp.lt.s32.totalorder %s2413_s9, %s2413_s9 }
 0xe4b   :  { %v1966_v40 = vrot.slane %v1965_v50, 1 }
 0xe4c   :  { %p2420_p0 = por %p2419_p13, %p2418_p12 }
 0xe4d   :  { %v1967_v54 = vadd.f32 %v1966_v40, %v1965_v50 }
 0xe4e   :  { %p2421_p1 = pnand %p2420_p0, %p2414_p11 }
 0xe4f   :  { %1968 = vrot.lane.b32.xlu1 %v1967_v54, %s2447_s23 }
 0xe50   :  { %v1769_v55 = vpop.permute.xlu0 %1768 }
 0xe51   :  { %v1770_v56 = vadd.f32 %v1769_v55, %v1767_v33 }
 0xe53   :  { %v1771_v57 = vmul.f32 0.001953125, %v1770_v56 }
 0xe55   :  { %v1775_v58 = vrot.slane %v1771_v57, %v2591_v20 }
 0xe57   :  { %v1776_v59 = vsub.f32 %v1746_v7, %v1775_v58  ;;  %v1777_v60 = vsub.f32 %v2866_v1, %v1775_v58  ;;  %v1778_v61 = vsub.f32 %v1748_v8, %v1775_v58  ;;  %v1779_v62 = vsub.f32 %v1749_v13, %v1775_v58 }
 0xe59   :  { %v1780_v63 = vmul.f32 %v1776_v59, %v1776_v59  ;;  %v1781_v2 = vmul.f32 %v1777_v60, %v1777_v60  ;;  %v1782_v3 = vmul.f32 %v1778_v61, %v1778_v61  ;;  %v1783_v6 = vmul.f32 %v1779_v62, %v1779_v62 }
 0xe5b   :  { %v1784_v5 = vadd.f32 %v1781_v2, %v1780_v63 }
 0xe5d   :  { %v1785_v9 = vadd.f32 %v1784_v5, %v1782_v3 }
 0xe5f   :  { %v1786_v10 = vadd.f32 %v1785_v9, %v1783_v6 }
 0xe61   :  { %v1787_v0 = vrot.slane %v1786_v10, 4 }
 0xe63   :  { %v1788_v11 = vadd.f32 %v1787_v0, %v1786_v10 }
 0xe65   :  { %v1789_v12 = vrot.slane %v1788_v11, 2 }
 0xe67   :  { %v1790_v14 = vadd.f32 %v1789_v12, %v1788_v11 }
 0xe69   :  { %v1791_v15 = vrot.slane %v1790_v14, 1 }
 0xe6b   :  { %v1792_v16 = vadd.f32 %v1791_v15, %v1790_v14 }
 0xe6d   :  { %1793 = vrot.lane.b32.xlu0 %v1792_v16, %s2447_s23 }
 0xec1   :  { %v1969_v7 = vpop.permute.xlu1 %1968 }
 0xec2   :  { %v1970_v17 = vadd.f32 %v1969_v7, %v1967_v54 }
 0xec4   :  { %1971 = vrot.lane.b32.xlu1 %v1970_v17, %s2451_s4 }
 0xedf   :  { %v1794_v1 = vpop.permute.xlu0 %1793 }
 0xee0   :  { %v1795_v8 = vadd.f32 %v1794_v1, %v1792_v16 }
 0xee2   :  { %1796 = vrot.lane.b32.xlu0 %v1795_v8, %s2451_s4 }
 0xf36   :  { %v1972_v13 = vpop.permute.xlu1 %1971 }
 0xf37   :  { %v1973_v18 = vadd.f32 %v1972_v13, %v1970_v17 }
 0xf39   :  { %1974 = vrot.lane.b32.xlu1 %v1973_v18, %s2452_s10 }
 0xf54   :  { %v1797_v19 = vpop.permute.xlu0 %1796 }
 0xf55   :  { %v1798_v21 = vadd.f32 %v1797_v19, %v1795_v8 }
 0xf57   :  { %1799 = vrot.lane.b32.xlu0 %v1798_v21, %s2452_s10 }
 0xfab   :  { %v1975_v22 = vpop.permute.xlu1 %1974 }
 0xfac   :  { %v1976_v23 = vadd.f32 %v1975_v22, %v1973_v18 }
 0xfae   :  { %1977 = vrot.lane.b32.xlu1 %v1976_v23, %s2442_s28 }
 0xfc9   :  { %v1800_v24 = vpop.permute.xlu0 %1799 }
 0xfca   :  { %v1801_v4 = vadd.f32 %v1800_v24, %v1798_v21 }
 0xfcc   :  { %1802 = vrot.lane.b32.xlu0 %v1801_v4, %s2442_s28 }
0x1020   :  { %v1978_v25 = vpop.permute.xlu1 %1977 }
0x1021   :  { %v1979_v26 = vadd.f32 %v1978_v25, %v1976_v23 }
0x1023   :  { %v1980_v49 = vmul.f32 0.001953125, %v1979_v26 }
0x1025   :  { %v1982_v27 = vadd.f32 1e-05, %v1980_v49 }
0x1027   :  { %2309 = vrsqrt.f32 %v1982_v27 }
0x1034   :  { %v2310_v33 = vpop.eup %2309 }
0x1035   :  { %v1984_v35 = vmul.f32 %v2310_v33, %v1981_v34 }
0x1037   :  { %v1989_v36 = vrot.slane %v1984_v35, %v2591_v20 }
0x1039   :  { %v1991_v44 = vmul.f32 %v1989_v36, %v2877_v30  ;;  %v1992_v46 = vmul.f32 %v1989_v36, %v2879_v38  ;;  %v1993_v47 = vmul.f32 %v1989_v36, %v2882_v39  ;;  %v1994_v48 = vmul.f32 %v1989_v36, %v2885_v41 }
0x103b   :  { %v2002_v54 = vadd.f32 %v2133_v45, %v1991_v44  ;;  %v2003_v38 = vadd.f32 %v2133_v45, %v1992_v46  ;;  %v2004_v55 = vadd.f32 %v2133_v45, %v1993_v47  ;;  %v2005_v39 = vadd.f32 %v2133_v45, %v1994_v48 }
0x103e   :  { %v1803_v28 = vpop.permute.xlu0 %1802 }
0x103f   :  { %v1804_v29 = vadd.f32 %v1803_v28, %v1801_v4 }
0x1041   :  { %v1805_v31 = vmul.f32 0.001953125, %v1804_v29 }
0x1043   :  { %v1807_v32 = vadd.f32 1e-05, %v1805_v31 }
0x1045   :  { %2311 = vrsqrt.f32 %v1807_v32 }
0x1052   :  { %v2312_v42 = vpop.eup %2311 }
0x1053   :  { %v1809_v43 = vmul.f32 %v2312_v42, %v1806_v37 }
0x1055   :  { %v1814_v51 = vrot.slane %v1809_v43, %v2591_v20 }
0x1057   :  { %v1816_v53 = vmul.f32 %v1814_v51, %v1776_v59  ;;  %v1817_v50 = vmul.f32 %v1814_v51, %v1777_v60  ;;  %v1818_v40 = vmul.f32 %v1814_v51, %v1778_v61  ;;  %v1819_v30 = vmul.f32 %v1814_v51, %v1779_v62 }
0x1059   :  { %v1827_v56 = vadd.f32 %v2126_v52, %v1816_v53  ;;  %v1828_v41 = vadd.f32 %v2126_v52, %v1817_v50  ;;  %v1829_v57 = vadd.f32 %v2126_v52, %v1818_v40  ;;  %v1830_v20 = vadd.f32 %v2126_v52, %v1819_v30 }
0x105b   :  { %v2006_v58 = vadd.f32 %v2002_v54, %v1827_v56  ;;  %v2007_v63 = vadd.f32 %v2003_v38, %v1828_v41  ;;  %v2008_v2 = vadd.f32 %v2004_v55, %v1829_v57  ;;  %v2009_v3 = vadd.f32 %v2005_v39, %v1830_v20 }
0x105d   :  { %v2010_v5 = vmax.f32 %v2006_v58, 0.0  ;;  %v2011_v6 = vmax.f32 %v2007_v63, 0.0  ;;  %v2012_v59 = vmax.f32 %v2008_v2, 0.0  ;;  %v2013_v60 = vmax.f32 %v2009_v3, 0.0 }
0x105f   :  { %2014 = vst [vmem:[#allocation13] sm:$0xff] %v2010_v5  ;;  %2015 = vst [vmem:[#allocation13 + $0x8] sm:$0xff] %v2011_v6 }
0x1060   :  { %2016 = vst [vmem:[#allocation13 + $0x10] sm:$0xff] %v2012_v59  ;;  %2017 = vst [vmem:[#allocation13 + $0x18] sm:$0xff] %v2013_v60 }
0x1061   :  { %2424 = shalt.err (!%p2421_p1)
}
0x1062   :  { %2029 = dma.vmem_to_hbm [thread:$0]  %s2024_s30, 512, %s2942_s13, [#allocation6], %s2446_s22, %s2446_s22, %s2447_s23  }
0x1063   :  { %2439 = dma.done.wait [#allocation6], 512  }
0x1064   :  { %2440 = vsyncadd [#allocation6], 4294966784 }
0x1065   :  { %2033 = vsyncpa [#allocation5], 1 }
0x1066   :  { %2034 = vsyncpa [#allocation8], 1 }
0x1067   :  { %2035 = vsyncpa [#allocation11], 1 }
0x1068   :  { %2036 = vsyncpa [#allocation6], 1 }

</bundles_post_ra>
